<compile_context>
chip_gen: v6e
topology: v6e:2x2x1
jax: 0.10.0
libtpu: 0.0.40
codegen_flags: <defaults>
</compile_context>

<pallas_src>
import functools

import jax
import jax.numpy as jnp
from jax.experimental import pallas as pl
from jax.experimental.pallas import tpu as pltpu


def _self_attention_kernel(x_ref, wh_ref, b_ref, v_ref, mask_ref, out_ref):
    # x_ref   : [Bt, L_pad, H] bf16   block of encoder-output rows
    # wh_ref  : [H, A]         bf16   Wh weight (transposed vs torch Linear)
    # b_ref   : [1, A]         f32    additive bias
    # v_ref   : [1, A]         f32    v weight as a row
    # mask_ref: [Bt, L_pad]    int32  nonzero where the position is masked out
    # out_ref : [Bt, L_pad]    f32    attention distribution (padded cols get 0)
    bt, l_pad, h = x_ref.shape

    # ---- energy = tanh(x @ Wh + b) ------------------------------------------
    # Collapse (Bt, L_pad) into one big M dimension so the MXU sees a single
    # (Bt*L_pad, H) @ (H, A) matmul instead of Bt tiny ones.  bf16 inputs,
    # f32 accumulation.
    x2 = x_ref[...].reshape(bt * l_pad, h)                                  # leading-dim collapse only
    energy = jnp.dot(x2, wh_ref[...], preferred_element_type=jnp.float32)   # [M, A] f32 on the MXU
    energy = jnp.tanh(energy + b_ref[...])                                  # VPU add + EUP tanh

    # ---- e = energy @ v  as a VPU multiply + lane reduce (no N=1 MXU pass) --
    e_col = jnp.sum(energy * v_ref[...], axis=-1, keepdims=True)            # [M, 1] f32

    # Relayout the [M, 1] column into a lane-dense [Bt, L_pad] slab using only
    # static slices, 2-D transposes and a concatenate (all lower cleanly on TPU).
    rows = [e_col[i * l_pad:(i + 1) * l_pad, :].T for i in range(bt)]        # Bt x [1, L_pad]
    e = jnp.concatenate(rows, axis=0)                                        # [Bt, L_pad]

    # ---- masked softmax over source_len (lane axis) --------------------------
    # Large finite fill instead of -inf: masked positions still get exactly 0
    # weight (exp underflows), and fully-masked rows stay NaN-free.
    e = jnp.where(mask_ref[...] != 0, -1e30, e)
    e_max = jnp.max(e, axis=-1, keepdims=True)
    ex = jnp.exp(e - e_max)
    denom = jnp.sum(ex, axis=-1, keepdims=True)                              # [Bt, 1]
    # Exact reciprocal: one f32 divide per row (cheap), broadcast-multiplied
    # across lanes.  The approx EUP reciprocal was not accurate enough for the
    # rows to sum to 1 within 2e-3.
    inv = 1.0 / denom                                                        # [Bt, 1] exact
    out_ref[...] = ex * inv


def _round_up(x, m):
    return ((x + m - 1) // m) * m


@functools.partial(jax.jit, static_argnames=("block_batch",))
def self_attention(encoder_outputs, mask, wh, b, v, *, block_batch=8):
    """Pointer self-attention.

    Args:
      encoder_outputs: [B, L, H] float32
      mask:            [B, L] bool, True = position masked out
      wh:              [H, A] float32 (torch Wh.weight.T)
      b:               [1, A] float32 (torch self.b[0])
      v:               [A, 1] float32 (torch v.weight.T)
    Returns:
      attention: [B, L] float32, softmax over L (masked positions get 0 weight).
    """
    B, L, H = encoder_outputs.shape
    A = wh.shape[1]

    bt = block_batch
    lpad = _round_up(max(L, 128), 128)       # lane-dense logits / output
    bpad = _round_up(B, bt)
    nb = bpad // bt

    # bf16 copy of the big operands for the MXU; tiny params stay f32.
    x = jnp.pad(encoder_outputs.astype(jnp.bfloat16),
                ((0, bpad - B), (0, lpad - L), (0, 0)))
    # Padded rows / columns are masked (True) so they receive zero weight.
    mask_i = jnp.pad(mask, ((0, bpad - B), (0, lpad - L)),
                     constant_values=True).astype(jnp.int32)
    wh_bf = wh.astype(jnp.bfloat16)
    b_row = b.astype(jnp.float32).reshape(1, A)
    v_row = v.astype(jnp.float32).reshape(1, A)

    # Per-step VMEM: 2 * bt * lpad * H bytes (bf16, double-buffered) plus the tiny
    # shared params -- far below the scoped limit on v5e/v6e/v7x for these tiles.
    # For very long L, tile the L axis with an online softmax instead.
    out = pl.pallas_call(
        _self_attention_kernel,
        out_shape=jax.ShapeDtypeStruct((bpad, lpad), jnp.float32),
        grid_spec=pltpu.PrefetchScalarGridSpec(
            num_scalar_prefetch=0,
            grid=(nb,),
            in_specs=[
                pl.BlockSpec((bt, lpad, H), lambda i: (i, 0, 0)),   # encoder outputs
                pl.BlockSpec((H, A), lambda i: (0, 0)),             # Wh (shared)
                pl.BlockSpec((1, A), lambda i: (0, 0)),             # b  (shared)
                pl.BlockSpec((1, A), lambda i: (0, 0)),             # v  (shared)
                pl.BlockSpec((bt, lpad), lambda i: (i, 0)),         # mask
            ],
            out_specs=pl.BlockSpec((bt, lpad), lambda i: (i, 0)),
        ),
        compiler_params=pltpu.CompilerParams(
            dimension_semantics=("parallel",)),   # batch tiles shard across v7x's 2 TCs
    )(x, wh_bf, b_row, v_row, mask_i)

    # Padded L columns carry exactly zero weight, so slicing preserves the softmax.
    return out[:B, :L]


def self_attention_reference(encoder_outputs, mask, wh, b, v):
    energy = jnp.tanh(jnp.einsum("blh,ha->bla", encoder_outputs, wh) + b[None])
    e = jnp.einsum("bla,ao->bl", energy, v)
    e = jnp.where(mask, -jnp.inf, e)
    return jax.nn.softmax(e, axis=1)


def _run_case(key, B, L, H, A, block_batch):
    k_x, k_wh, k_b, k_v, k_m = jax.random.split(key, 5)
    encoder_outputs = jax.random.normal(k_x, (B, L, H), dtype=jnp.float32)
    wh = jax.random.normal(k_wh, (H, A), dtype=jnp.float32) * 0.1   # Wh.weight.T
    b = jax.random.normal(k_b, (1, A), dtype=jnp.float32)           # self.b[0]
    v = jax.random.normal(k_v, (A, 1), dtype=jnp.float32) * 0.1     # v.weight.T
    mask = jax.random.uniform(k_m, (B, L)) < 0.25                   # True = masked
    mask = mask.at[:, 0].set(False)                                 # keep every row non-empty

    attn = self_attention(encoder_outputs, mask, wh, b, v, block_batch=block_batch)
    attn = jax.block_until_ready(attn)

    # Reference uses the same bf16-rounded matmul inputs as the kernel.
    x_r = encoder_outputs.astype(jnp.bfloat16).astype(jnp.float32)
    wh_r = wh.astype(jnp.bfloat16).astype(jnp.float32)
    ref = self_attention_reference(x_r, mask, wh_r, b, v)

    assert attn.shape == (B, L)
    # bf16 matmul inputs -> modest tolerance on individual weights.
    assert jnp.allclose(attn, ref, atol=2e-3, rtol=2e-3), (
        f"mismatch vs reference: max abs err {jnp.max(jnp.abs(attn - ref))}")
    # Exact f32 division: rows sum to 1 to rounding.
    assert jnp.allclose(jnp.sum(attn, axis=1), 1.0, atol=2e-3)
    assert jnp.all(jnp.where(mask, attn, 0.0) == 0.0)   # masked positions get 0 weight


if __name__ == "__main__":
    key = jax.random.PRNGKey(0)
    k1, k2 = jax.random.split(key)

    # Small shapes consistent with the module's forward (batch, source_len, enc_hidden, attn_size).
    _run_case(k1, B=2, L=8, H=32, A=64, block_batch=8)
    # Exercise multi-step grid plus padding in both batch and source_len.
    _run_case(k2, B=13, L=40, H=48, A=96, block_batch=4)

    print("KERNEL_OK")
</pallas_src>

<mosaic_0001>
module attributes {stable_mosaic.version = 11 : i64} {
  func.func @_self_attention_kernel(%arg0: i32, %arg1: memref<8x128x32xbf16, #tpu.memory_space<vmem>>, %arg2: memref<32x64xbf16, #tpu.memory_space<vmem>>, %arg3: memref<1x64xf32, #tpu.memory_space<vmem>>, %arg4: memref<1x64xf32, #tpu.memory_space<vmem>>, %arg5: memref<8x128xi32, #tpu.memory_space<vmem>>, %arg6: memref<8x128xf32, #tpu.memory_space<vmem>>) attributes {dimension_semantics = [#tpu.dimension_semantics<parallel>], iteration_bounds = array<i64: 1>, scalar_prefetch = 0 : i64, scratch_operands = 0 : i64, tpu.core_type = #tpu.core_type<tc>, window_params = [{transform_indices = @transform_0, window_bounds = array<i64: 8, 128, 32>}, {pipeline_mode = #tpu.pipeline_mode<synchronous>, transform_indices = @transform_1, window_bounds = array<i64: 32, 64>}, {pipeline_mode = #tpu.pipeline_mode<synchronous>, transform_indices = @transform_2, window_bounds = array<i64: 1, 64>}, {pipeline_mode = #tpu.pipeline_mode<synchronous>, transform_indices = @transform_3, window_bounds = array<i64: 1, 64>}, {transform_indices = @transform_4, window_bounds = array<i64: 8, 128>}, {transform_indices = @transform_5, window_bounds = array<i64: 8, 128>}]} {
    %c0 = arith.constant 0 : index
    %c0_0 = arith.constant 0 : index
    %c0_1 = arith.constant 0 : index
    %0 = vector.load %arg1[%c0, %c0_0, %c0_1] : memref<8x128x32xbf16, #tpu.memory_space<vmem>>, vector<8x128x32xbf16>
    %1 = vector.shape_cast %0 : vector<8x128x32xbf16> to vector<1024x32xbf16>
    %c0_2 = arith.constant 0 : index
    %c0_3 = arith.constant 0 : index
    %2 = vector.load %arg2[%c0_2, %c0_3] : memref<32x64xbf16, #tpu.memory_space<vmem>>, vector<32x64xbf16>
    %cst = arith.constant dense<0.000000e+00> : vector<1024x64xf32>
    %3 = tpu.matmul %1, %2, %cst {dimension_numbers = #tpu.dot_dimension_numbers<[1], [0], [0], [1], [0, 0, 1, 1], [], []>} : vector<1024x32xbf16>, vector<32x64xbf16>, vector<1024x64xf32> -> vector<1024x64xf32>
    %c0_4 = arith.constant 0 : index
    %c0_5 = arith.constant 0 : index
    %4 = vector.load %arg3[%c0_4, %c0_5] : memref<1x64xf32, #tpu.memory_space<vmem>>, vector<1x64xf32>
    %5 = vector.broadcast %4 : vector<1x64xf32> to vector<1024x64xf32>
    %6 = arith.addf %3, %5 : vector<1024x64xf32>
    %7 = math.tanh %6 : vector<1024x64xf32>
    %c0_6 = arith.constant 0 : index
    %c0_7 = arith.constant 0 : index
    %8 = vector.load %arg4[%c0_6, %c0_7] : memref<1x64xf32, #tpu.memory_space<vmem>>, vector<1x64xf32>
    %9 = vector.broadcast %8 : vector<1x64xf32> to vector<1024x64xf32>
    %10 = arith.mulf %7, %9 : vector<1024x64xf32>
    %cst_8 = arith.constant dense<0.000000e+00> : vector<1024xf32>
    %11 = vector.multi_reduction <add>, %10, %cst_8 [1] : vector<1024x64xf32> to vector<1024xf32>
    %12 = vector.shape_cast %11 : vector<1024xf32> to vector<1024x1xf32>
    %13 = vector.extract_strided_slice %12 {offsets = [0, 0], sizes = [128, 1], strides = [1, 1]} : vector<1024x1xf32> to vector<128x1xf32>
    %14 = tpu.transpose %13, [1, 0] : vector<128x1xf32> -> vector<1x128xf32>
    %15 = vector.extract_strided_slice %12 {offsets = [128, 0], sizes = [128, 1], strides = [1, 1]} : vector<1024x1xf32> to vector<128x1xf32>
    %16 = tpu.transpose %15, [1, 0] : vector<128x1xf32> -> vector<1x128xf32>
    %17 = vector.extract_strided_slice %12 {offsets = [256, 0], sizes = [128, 1], strides = [1, 1]} : vector<1024x1xf32> to vector<128x1xf32>
    %18 = tpu.transpose %17, [1, 0] : vector<128x1xf32> -> vector<1x128xf32>
    %19 = vector.extract_strided_slice %12 {offsets = [384, 0], sizes = [128, 1], strides = [1, 1]} : vector<1024x1xf32> to vector<128x1xf32>
    %20 = tpu.transpose %19, [1, 0] : vector<128x1xf32> -> vector<1x128xf32>
    %21 = vector.extract_strided_slice %12 {offsets = [512, 0], sizes = [128, 1], strides = [1, 1]} : vector<1024x1xf32> to vector<128x1xf32>
    %22 = tpu.transpose %21, [1, 0] : vector<128x1xf32> -> vector<1x128xf32>
    %23 = vector.extract_strided_slice %12 {offsets = [640, 0], sizes = [128, 1], strides = [1, 1]} : vector<1024x1xf32> to vector<128x1xf32>
    %24 = tpu.transpose %23, [1, 0] : vector<128x1xf32> -> vector<1x128xf32>
    %25 = vector.extract_strided_slice %12 {offsets = [768, 0], sizes = [128, 1], strides = [1, 1]} : vector<1024x1xf32> to vector<128x1xf32>
    %26 = tpu.transpose %25, [1, 0] : vector<128x1xf32> -> vector<1x128xf32>
    %27 = vector.extract_strided_slice %12 {offsets = [896, 0], sizes = [128, 1], strides = [1, 1]} : vector<1024x1xf32> to vector<128x1xf32>
    %28 = tpu.transpose %27, [1, 0] : vector<128x1xf32> -> vector<1x128xf32>
    %29 = tpu.concatenate %14, %16, %18, %20, %22, %24, %26, %28 in 0 : vector<1x128xf32>, vector<1x128xf32>, vector<1x128xf32>, vector<1x128xf32>, vector<1x128xf32>, vector<1x128xf32>, vector<1x128xf32>, vector<1x128xf32> -> vector<8x128xf32>
    %c0_9 = arith.constant 0 : index
    %c0_10 = arith.constant 0 : index
    %30 = vector.load %arg5[%c0_9, %c0_10] : memref<8x128xi32, #tpu.memory_space<vmem>>, vector<8x128xi32>
    %c0_i32 = arith.constant 0 : i32
    %31 = vector.broadcast %c0_i32 : i32 to vector<8x128xi32>
    %32 = arith.cmpi ne, %30, %31 : vector<8x128xi32>
    %cst_11 = arith.constant -1.000000e+30 : f32
    %33 = vector.broadcast %cst_11 : f32 to vector<8x128xf32>
    %34 = arith.select %32, %33, %29 : vector<8x128xi1>, vector<8x128xf32>
    %cst_12 = arith.constant dense<0xFF800000> : vector<8xf32>
    %35 = vector.multi_reduction <maximumf>, %34, %cst_12 [1] : vector<8x128xf32> to vector<8xf32>
    %36 = vector.shape_cast %35 : vector<8xf32> to vector<8x1xf32>
    %37 = vector.broadcast %36 : vector<8x1xf32> to vector<8x128xf32>
    %38 = arith.subf %34, %37 : vector<8x128xf32>
    %39 = math.exp %38 : vector<8x128xf32>
    %cst_13 = arith.constant dense<0.000000e+00> : vector<8xf32>
    %40 = vector.multi_reduction <add>, %39, %cst_13 [1] : vector<8x128xf32> to vector<8xf32>
    %41 = vector.shape_cast %40 : vector<8xf32> to vector<8x1xf32>
    %cst_14 = arith.constant 1.000000e+00 : f32
    %42 = vector.broadcast %cst_14 : f32 to vector<8x1xf32>
    %43 = arith.divf %42, %41 : vector<8x1xf32>
    %44 = vector.broadcast %43 : vector<8x1xf32> to vector<8x128xf32>
    %45 = arith.mulf %39, %44 : vector<8x128xf32>
    %c0_15 = arith.constant 0 : index
    %c0_16 = arith.constant 0 : index
    %46 = vector.load %arg6[%c0_15, %c0_16] : memref<8x128xf32, #tpu.memory_space<vmem>>, vector<8x128xf32>
    tpu.vector_store %arg6[%c0_15, %c0_16], %45 {strides = array<i32>} : memref<8x128xf32, #tpu.memory_space<vmem>>, vector<8x128xf32>,
    return
  }
  func.func @transform_0(%arg0: i32) -> (i32, i32, i32) {
    %c0_i32 = arith.constant 0 : i32
    %c0_i32_0 = arith.constant 0 : i32
    %c0_i32_1 = arith.constant 0 : i32
    return %arg0, %c0_i32, %c0_i32_0 : i32, i32, i32
  }
  func.func @transform_1(%arg0: i32) -> (i32, i32) {
    %c0_i32 = arith.constant 0 : i32
    %c0_i32_0 = arith.constant 0 : i32
    %c0_i32_1 = arith.constant 0 : i32
    return %c0_i32, %c0_i32_0 : i32, i32
  }
  func.func @transform_2(%arg0: i32) -> (i32, i32) {
    %c0_i32 = arith.constant 0 : i32
    %c0_i32_0 = arith.constant 0 : i32
    %c0_i32_1 = arith.constant 0 : i32
    return %c0_i32, %c0_i32_0 : i32, i32
  }
  func.func @transform_3(%arg0: i32) -> (i32, i32) {
    %c0_i32 = arith.constant 0 : i32
    %c0_i32_0 = arith.constant 0 : i32
    %c0_i32_1 = arith.constant 0 : i32
    return %c0_i32, %c0_i32_0 : i32, i32
  }
  func.func @transform_4(%arg0: i32) -> (i32, i32) {
    %c0_i32 = arith.constant 0 : i32
    %c0_i32_0 = arith.constant 0 : i32
    return %arg0, %c0_i32 : i32, i32
  }
  func.func @transform_5(%arg0: i32) -> (i32, i32) {
    %c0_i32 = arith.constant 0 : i32
    %c0_i32_0 = arith.constant 0 : i32
    return %arg0, %c0_i32 : i32, i32
  }
}

</mosaic_0001>

<bundles_post_ra>
// kernel: self_attention.1
= control target key start
LH: loop header
LB: loop body
LE: loop exit
PB: predicated region body
PF: predicated region fallthrough
CT: control target
= control target key end

     0   :  { %vm492_vm0 = vcmask 261120   ;;  %vm1493_vm1 = vcmask 523264   ;;  %vm2155_vm2 = vcmask 1040384   ;;  %vm2157_vm3 = vcmask 1041408   ;;  %s3827_s1 = inlined_call_operand.vmem [shape: bf16[32,64], index: 1, kind: input, shape index: {}]   ;;  %s3828_s0 = inlined_call_operand.vmem [shape: bf16[8,128,32], index: 0, kind: input, shape index: {}]   ;;  %s3829_s2 = inlined_call_operand.vmem [shape: f32[1,64], index: 2, kind: input, shape index: {}]   ;;  %s3830_s3 = inlined_call_operand.vmem [shape: f32[1,64], index: 3, kind: input, shape index: {}]   ;;  %s3831_s4 = inlined_call_operand.vmem [shape: s32[8,128], index: 4, kind: input, shape index: {}]   ;;  %s3832_s5 = inlined_call_operand.vmem [shape: f32[8,128], index: 5, kind: output, shape index: {}]  }
   0x1   :  { %v2521_v0 = vld [vmem:[%s3827_s1 + $0x8] sm:$0xff]   ;;  %v2522_v1 = vld [vmem:[%s3827_s1] sm:$0xff]   ;;  %v2527_v6 = vld [vmem:[%s3828_s0 + $0x10] sm:$0xff]   ;;  %vm2159_vm4 = vcmask 1042432   ;;  %vm2161_vm5 = vcmask 1043456   ;;  %vm2163_vm6 = vcmask 1044480  }
   0x2   :  { %2385 = vmatprep.subr.bf16.mxu0 %v2521_v0  ;;  %2517 = vmatprep.subr.bf16.mxu1 %v2521_v0  ;;  %v2523_v2 = vld [vmem:[%s3828_s0] sm:$0xff]   ;;  %v2525_v4 = vld [vmem:[%s3828_s0 + $0x8] sm:$0xff]   ;;  %v2529_v7 = vld [vmem:[%s3828_s0 + $0x110] sm:$0xff]   ;;  %vm2165_vm7 = vcmask 1045504   ;;  %vm2167_vm8 = vcmask 1046528  }
   0x3   :  { %2386 = vmatpush3.bf16.msra.mxu0 %v2521_v0  ;;  %2519 = vmatpush3.bf16.msra.mxu1 %v2521_v0  ;;  %v2524_v3 = vld [vmem:[%s3828_s0 + $0x100] sm:$0xff]   ;;  %v2526_v5 = vld [vmem:[%s3828_s0 + $0x108] sm:$0xff]   ;;  %v2528_v8 = vld [vmem:[%s3828_s0 + $0x18] sm:$0xff]  }
   0x4   :  { %2387 = vmatprep.subr.bf16.mxu0 %v2522_v1  ;;  %2518 = vmatprep.subr.bf16.mxu1 %v2522_v1  ;;  %v2530_v9 = vld [vmem:[%s3828_s0 + $0x118] sm:$0xff]   ;;  %v2531_v10 = vld [vmem:[%s3828_s0 + $0x20] sm:$0xff]   ;;  %v2532_v12 = vld [vmem:[%s3828_s0 + $0x28] sm:$0xff]  }
   0x5   :  { %2389 = vmatprep.mubr.msk.bf16.mxu0 %vm492_vm0, %v2523_v2  ;;  %2453 = vmatprep.mubr.msk.bf16.mxu1 %vm492_vm0, %v2524_v3  ;;  %v2533_v11 = vld [vmem:[%s3828_s0 + $0x120] sm:$0xff]   ;;  %v2534_v13 = vld [vmem:[%s3828_s0 + $0x128] sm:$0xff]   ;;  %v2535_v14 = vld [vmem:[%s3828_s0 + $0x30] sm:$0xff]  }
   0x6   :  { %v2537_v15 = vld [vmem:[%s3828_s0 + $0x130] sm:$0xff]   ;;  %v2536_v16 = vld [vmem:[%s3828_s0 + $0x38] sm:$0xff]   ;;  %v2539_v18 = vld [vmem:[%s3828_s0 + $0x40] sm:$0xff]  }
   0x7   :  { %2388 = vmatpush3.bf16.msra.mxu0 %v2522_v1  ;;  %2520 = vmatpush3.bf16.msra.mxu1 %v2522_v1  ;;  %v2538_v17 = vld [vmem:[%s3828_s0 + $0x138] sm:$0xff]   ;;  %v2541_v19 = vld [vmem:[%s3828_s0 + $0x140] sm:$0xff]   ;;  %v2540_v20 = vld [vmem:[%s3828_s0 + $0x48] sm:$0xff]  }
   0x8   :  { %v2542_v21 = vld [vmem:[%s3828_s0 + $0x148] sm:$0xff]   ;;  %v2543_v22 = vld [vmem:[%s3828_s0 + $0x50] sm:$0xff]   ;;  %v2544_v24 = vld [vmem:[%s3828_s0 + $0x58] sm:$0xff]  }
   0x9   :  { %v2545_v23 = vld [vmem:[%s3828_s0 + $0x150] sm:$0xff]   ;;  %v2546_v25 = vld [vmem:[%s3828_s0 + $0x158] sm:$0xff]   ;;  %v2547_v26 = vld [vmem:[%s3828_s0 + $0x60] sm:$0xff]  }
   0xa   :  { %2390 = vmatmul.mubr.msk.bf16.vlgmr.msra.gmra.mxu0 %vm492_vm0, %v2525_v4  ;;  %2454 = vmatmul.mubr.msk.bf16.vlgmr.msra.gmra.mxu1 %vm492_vm0, %v2526_v5  ;;  %v2549_v27 = vld [vmem:[%s3828_s0 + $0x160] sm:$0xff]   ;;  %v2548_v28 = vld [vmem:[%s3828_s0 + $0x68] sm:$0xff]   ;;  %v2551_v30 = vld [vmem:[%s3828_s0 + $0x70] sm:$0xff]  }
   0xb   :  { %2393 = vmatprep.mubr.msk.bf16.mxu0 %vm492_vm0, %v2527_v6  ;;  %2457 = vmatprep.mubr.msk.bf16.mxu1 %vm492_vm0, %v2529_v7  ;;  %v2550_v29 = vld [vmem:[%s3828_s0 + $0x168] sm:$0xff]   ;;  %v2553_v31 = vld [vmem:[%s3828_s0 + $0x170] sm:$0xff]   ;;  %v2552_v32 = vld [vmem:[%s3828_s0 + $0x78] sm:$0xff]  }
   0xc   :  { %v2554_v33 = vld [vmem:[%s3828_s0 + $0x178] sm:$0xff]   ;;  %v2555_v34 = vld [vmem:[%s3828_s0 + $0x80] sm:$0xff]   ;;  %v2556_v36 = vld [vmem:[%s3828_s0 + $0x88] sm:$0xff]  }
   0xd   :  { %v2557_v35 = vld [vmem:[%s3828_s0 + $0x180] sm:$0xff]   ;;  %v2558_v37 = vld [vmem:[%s3828_s0 + $0x188] sm:$0xff]   ;;  %v2559_v38 = vld [vmem:[%s3828_s0 + $0x90] sm:$0xff]  }
   0xe   :  { %v2561_v39 = vld [vmem:[%s3828_s0 + $0x190] sm:$0xff]   ;;  %v2560_v40 = vld [vmem:[%s3828_s0 + $0x98] sm:$0xff]   ;;  %v2563_v42 = vld [vmem:[%s3828_s0 + $0xa0] sm:$0xff]  }
   0xf   :  { %v2562_v41 = vld [vmem:[%s3828_s0 + $0x198] sm:$0xff]   ;;  %v2565_v43 = vld [vmem:[%s3828_s0 + $0x1a0] sm:$0xff]   ;;  %v2564_v44 = vld [vmem:[%s3828_s0 + $0xa8] sm:$0xff]  }
  0x10   :  { %v2566_v45 = vld [vmem:[%s3828_s0 + $0x1a8] sm:$0xff]   ;;  %v2567_v46 = vld [vmem:[%s3828_s0 + $0xb0] sm:$0xff]   ;;  %v2568_v48 = vld [vmem:[%s3828_s0 + $0xb8] sm:$0xff]  }
  0x11   :  { %v2569_v47 = vld [vmem:[%s3828_s0 + $0x1b0] sm:$0xff]   ;;  %v2570_v49 = vld [vmem:[%s3828_s0 + $0x1b8] sm:$0xff]   ;;  %v2571_v50 = vld [vmem:[%s3828_s0 + $0xc0] sm:$0xff]  }
  0x12   :  { %2394 = vmatmul.mubr.msk.bf16.gmra.mxu0 %vm492_vm0, %v2528_v8  ;;  %2458 = vmatmul.mubr.msk.bf16.gmra.mxu1 %vm492_vm0, %v2530_v9  ;;  %v2573_v51 = vld [vmem:[%s3828_s0 + $0x1c0] sm:$0xff]   ;;  %v2572_v52 = vld [vmem:[%s3828_s0 + $0xc8] sm:$0xff]   ;;  %v2575_v54 = vld [vmem:[%s3828_s0 + $0xd0] sm:$0xff]  }
  0x13   :  { %2397 = vmatprep.mubr.msk.bf16.mxu0 %vm492_vm0, %v2531_v10  ;;  %2461 = vmatprep.mubr.msk.bf16.mxu1 %vm492_vm0, %v2533_v11  ;;  %v2574_v53 = vld [vmem:[%s3828_s0 + $0x1c8] sm:$0xff]   ;;  %v2577_v55 = vld [vmem:[%s3828_s0 + $0x1d0] sm:$0xff]   ;;  %v2576_v56 = vld [vmem:[%s3828_s0 + $0xd8] sm:$0xff]  }
  0x14   :  { %v2578_v57 = vld [vmem:[%s3828_s0 + $0x1d8] sm:$0xff]   ;;  %v2579_v58 = vld [vmem:[%s3828_s0 + $0xe0] sm:$0xff]   ;;  %v2580_v60 = vld [vmem:[%s3828_s0 + $0xe8] sm:$0xff]  }
  0x15   :  { %v2581_v59 = vld [vmem:[%s3828_s0 + $0x1e0] sm:$0xff]   ;;  %v2582_v61 = vld [vmem:[%s3828_s0 + $0x1e8] sm:$0xff]   ;;  %v2583_v62 = vld [vmem:[%s3828_s0 + $0xf0] sm:$0xff]  }
  0x16   :  { %v2585_v63 = vld [vmem:[%s3828_s0 + $0x1f0] sm:$0xff]   ;;  %v2584_v0 = vld [vmem:[%s3828_s0 + $0xf8] sm:$0xff]   ;;  %v3144_v2 = vld [vmem:[%s3829_s2] ss:$0 sm:$0xff] }
  0x17   :  { %v2586_v1 = vld [vmem:[%s3828_s0 + $0x1f8] sm:$0xff]  }
  0x1a   :  { %2398 = vmatmul.mubr.msk.bf16.gmra.mxu0 %vm492_vm0, %v2532_v12  ;;  %2462 = vmatmul.mubr.msk.bf16.gmra.mxu1 %vm492_vm0, %v2534_v13 }
  0x1b   :  { %2401 = vmatprep.mubr.msk.bf16.mxu0 %vm492_vm0, %v2535_v14  ;;  %2465 = vmatprep.mubr.msk.bf16.mxu1 %vm492_vm0, %v2537_v15 }
  0x22   :  { %2402 = vmatmul.mubr.msk.bf16.gmra.mxu0 %vm492_vm0, %v2536_v16  ;;  %2466 = vmatmul.mubr.msk.bf16.gmra.mxu1 %vm492_vm0, %v2538_v17 }
  0x23   :  { %2405 = vmatprep.mubr.msk.bf16.mxu0 %vm492_vm0, %v2539_v18  ;;  %2469 = vmatprep.mubr.msk.bf16.mxu1 %vm492_vm0, %v2541_v19 }
  0x2a   :  { %2406 = vmatmul.mubr.msk.bf16.gmra.mxu0 %vm492_vm0, %v2540_v20  ;;  %2470 = vmatmul.mubr.msk.bf16.gmra.mxu1 %vm492_vm0, %v2542_v21 }
  0x2b   :  { %2409 = vmatprep.mubr.msk.bf16.mxu0 %vm492_vm0, %v2543_v22  ;;  %2473 = vmatprep.mubr.msk.bf16.mxu1 %vm492_vm0, %v2545_v23 }
  0x32   :  { %2410 = vmatmul.mubr.msk.bf16.gmra.mxu0 %vm492_vm0, %v2544_v24  ;;  %2474 = vmatmul.mubr.msk.bf16.gmra.mxu1 %vm492_vm0, %v2546_v25 }
  0x33   :  { %2413 = vmatprep.mubr.msk.bf16.mxu0 %vm492_vm0, %v2547_v26  ;;  %2477 = vmatprep.mubr.msk.bf16.mxu1 %vm492_vm0, %v2549_v27  ;;  %v3159_v27 = vld [vmem:[%s3830_s3] ss:$0 sm:$0xff] }
  0x3a   :  { %2414 = vmatmul.mubr.msk.bf16.gmra.mxu0 %vm492_vm0, %v2548_v28  ;;  %2478 = vmatmul.mubr.msk.bf16.gmra.mxu1 %vm492_vm0, %v2550_v29 }
  0x3b   :  { %2417 = vmatprep.mubr.msk.bf16.mxu0 %vm492_vm0, %v2551_v30  ;;  %2481 = vmatprep.mubr.msk.bf16.mxu1 %vm492_vm0, %v2553_v31 }
  0x42   :  { %2418 = vmatmul.mubr.msk.bf16.gmra.mxu0 %vm492_vm0, %v2552_v32  ;;  %2482 = vmatmul.mubr.msk.bf16.gmra.mxu1 %vm492_vm0, %v2554_v33 }
  0x43   :  { %2421 = vmatprep.mubr.msk.bf16.mxu0 %vm492_vm0, %v2555_v34  ;;  %2485 = vmatprep.mubr.msk.bf16.mxu1 %vm492_vm0, %v2557_v35 }
  0x4a   :  { %2422 = vmatmul.mubr.msk.bf16.gmra.mxu0 %vm492_vm0, %v2556_v36  ;;  %2486 = vmatmul.mubr.msk.bf16.gmra.mxu1 %vm492_vm0, %v2558_v37 }
  0x4b   :  { %2425 = vmatprep.mubr.msk.bf16.mxu0 %vm492_vm0, %v2559_v38  ;;  %2489 = vmatprep.mubr.msk.bf16.mxu1 %vm492_vm0, %v2561_v39 }
  0x52   :  { %2426 = vmatmul.mubr.msk.bf16.gmra.mxu0 %vm492_vm0, %v2560_v40  ;;  %2490 = vmatmul.mubr.msk.bf16.gmra.mxu1 %vm492_vm0, %v2562_v41 }
  0x53   :  { %2429 = vmatprep.mubr.msk.bf16.mxu0 %vm492_vm0, %v2563_v42  ;;  %2493 = vmatprep.mubr.msk.bf16.mxu1 %vm492_vm0, %v2565_v43 }
  0x5a   :  { %2430 = vmatmul.mubr.msk.bf16.gmra.mxu0 %vm492_vm0, %v2564_v44  ;;  %2494 = vmatmul.mubr.msk.bf16.gmra.mxu1 %vm492_vm0, %v2566_v45 }
  0x5b   :  { %2433 = vmatprep.mubr.msk.bf16.mxu0 %vm492_vm0, %v2567_v46  ;;  %2497 = vmatprep.mubr.msk.bf16.mxu1 %vm492_vm0, %v2569_v47 }
  0x62   :  { %2434 = vmatmul.mubr.msk.bf16.gmra.mxu0 %vm492_vm0, %v2568_v48  ;;  %2498 = vmatmul.mubr.msk.bf16.gmra.mxu1 %vm492_vm0, %v2570_v49 }
  0x63   :  { %2437 = vmatprep.mubr.msk.bf16.mxu0 %vm492_vm0, %v2571_v50  ;;  %2501 = vmatprep.mubr.msk.bf16.mxu1 %vm492_vm0, %v2573_v51 }
  0x6a   :  { %2438 = vmatmul.mubr.msk.bf16.gmra.mxu0 %vm492_vm0, %v2572_v52  ;;  %2502 = vmatmul.mubr.msk.bf16.gmra.mxu1 %vm492_vm0, %v2574_v53 }
  0x6b   :  { %2441 = vmatprep.mubr.msk.bf16.mxu0 %vm492_vm0, %v2575_v54  ;;  %2505 = vmatprep.mubr.msk.bf16.mxu1 %vm492_vm0, %v2577_v55 }
  0x72   :  { %2442 = vmatmul.mubr.msk.bf16.gmra.mxu0 %vm492_vm0, %v2576_v56  ;;  %2506 = vmatmul.mubr.msk.bf16.gmra.mxu1 %vm492_vm0, %v2578_v57 }
  0x73   :  { %2445 = vmatprep.mubr.msk.bf16.mxu0 %vm492_vm0, %v2579_v58  ;;  %2509 = vmatprep.mubr.msk.bf16.mxu1 %vm492_vm0, %v2581_v59 }
  0x7a   :  { %2446 = vmatmul.mubr.msk.bf16.gmra.mxu0 %vm492_vm0, %v2580_v60  ;;  %2510 = vmatmul.mubr.msk.bf16.gmra.mxu1 %vm492_vm0, %v2582_v61 }
  0x7b   :  { %2449 = vmatprep.mubr.msk.bf16.mxu0 %vm492_vm0, %v2583_v62  ;;  %2513 = vmatprep.mubr.msk.bf16.mxu1 %vm492_vm0, %v2585_v63 }
  0x82   :  { %2450 = vmatmul.mubr.msk.bf16.gmra.mxu0 %vm492_vm0, %v2584_v0  ;;  %2514 = vmatmul.mubr.msk.bf16.gmra.mxu1 %vm492_vm0, %v2586_v1 }
  0xca   :  { %v2391_v3 = vpop.f32.mrf.mxu0  ;;  %v2455_v4 = vpop.f32.mrf.mxu1 }
  0xcb   :  { %v728_v5 = vadd.f32 %v2391_v3, %v3144_v2  ;;  %v984_v6 = vadd.f32 %v2455_v4, %v3144_v2 }
  0xcc   :  { %v719_v7 = vpop.f32.mrf.mxu0  ;;  %v975_v8 = vpop.f32.mrf.mxu1 }
  0xcd   :  { %2587 = vtanh.f32 %v728_v5  ;;  %v720_v9 = vadd.f32 %v3144_v2, %v719_v7  ;;  %v976_v10 = vadd.f32 %v3144_v2, %v975_v8 }
  0xce   :  { %2589 = vtanh.f32 %v984_v6  ;;  %v2392_v11 = vpop.f32.mrf.mxu0  ;;  %v2456_v12 = vpop.f32.mrf.mxu1 }
  0xcf   :  { %2591 = vtanh.f32 %v720_v9  ;;  %v731_v13 = vadd.f32 %v2392_v11, %v3144_v2  ;;  %v987_v14 = vadd.f32 %v2456_v12, %v3144_v2 }
  0xd0   :  { %2593 = vtanh.f32 %v976_v10  ;;  %v722_v15 = vpop.f32.mrf.mxu0  ;;  %v978_v16 = vpop.f32.mrf.mxu1 }
  0xd1   :  { %2595 = vtanh.f32 %v731_v13  ;;  %v979_v17 = vadd.f32 %v3144_v2, %v978_v16  ;;  %v723_v18 = vadd.f32 %v3144_v2, %v722_v15 }
  0xd2   :  { %2597 = vtanh.f32 %v987_v14  ;;  %v2395_v19 = vpop.f32.mrf.mxu0  ;;  %v2459_v20 = vpop.f32.mrf.mxu1 }
  0xd3   :  { %2599 = vtanh.f32 %v979_v17  ;;  %v744_v23 = vadd.f32 %v2395_v19, %v3144_v2  ;;  %v1000_v30 = vadd.f32 %v2459_v20, %v3144_v2 }
  0xd4   :  { %v735_v21 = vpop.f32.mrf.mxu0  ;;  %v991_v22 = vpop.f32.mrf.mxu1  ;;  %2601 = vtanh.f32 %v723_v18 }
  0xd5   :  { %v736_v41 = vadd.f32 %v3144_v2, %v735_v21  ;;  %v992_v53 = vadd.f32 %v3144_v2, %v991_v22 }
  0xd6   :  { %v2396_v24 = vpop.f32.mrf.mxu0  ;;  %v2460_v26 = vpop.f32.mrf.mxu1 }
  0xd7   :  { %v747_v25 = vadd.f32 %v2396_v24, %v3144_v2  ;;  %v1003_v28 = vadd.f32 %v2460_v26, %v3144_v2 }
  0xd8   :  { %v738_v31 = vpop.f32.mrf.mxu0  ;;  %v994_v42 = vpop.f32.mrf.mxu1 }
  0xd9   :  { %2603 = vtanh.f32 %v747_v25  ;;  %v739_v38 = vadd.f32 %v3144_v2, %v738_v31  ;;  %v995_v49 = vadd.f32 %v3144_v2, %v994_v42 }
  0xda   :  { %v2588_v29 = vpop.eup %2587  ;;  %2605 = vtanh.f32 %v744_v23  ;;  %v2399_v36 = vpop.f32.mrf.mxu0 }
  0xdb   :  { %v2590_v32 = vpop.eup %2589  ;;  %v1367_v33 = vmul.f32 %v2588_v29, %v3159_v27  ;;  %2607 = vtanh.f32 %v1003_v28  ;;  %v2463_v48 = vpop.f32.mrf.mxu1  ;;  %v760_v63 = vadd.f32 %v2399_v36, %v3144_v2 }
  0xdc   :  { %v2592_v34 = vpop.eup %2591  ;;  %v1431_v35 = vmul.f32 %v2590_v32, %v3159_v27  ;;  %2609 = vtanh.f32 %v1000_v30  ;;  %v751_v47 = vpop.f32.mrf.mxu0  ;;  %v1016_v9 = vadd.f32 %v2463_v48, %v3144_v2 }
  0xdd   :  { %v2594_v37 = vpop.eup %2593  ;;  %v1500_v39 = vsel %vm1493_vm1, %v1367_v33, 0.0  ;;  %v1365_v44 = vmul.f32 %v2592_v34, %v3159_v27  ;;  %2611 = vtanh.f32 %v739_v38  ;;  %v1007_v58 = vpop.f32.mrf.mxu1  ;;  %v752_v19 = vadd.f32 %v3144_v2, %v751_v47 }
  0xde   :  { %v2596_v40 = vpop.eup %2595  ;;  %v1692_v43 = vsel %vm1493_vm1, %v1431_v35, 0.0  ;;  %1501 = vadd.xlane.f32.xlu1 %v1500_v39  ;;  %2613 = vtanh.f32 %v736_v41  ;;  %v1429_v55 = vmul.f32 %v2594_v37, %v3159_v27  ;;  %v2400_v57 = vpop.f32.mrf.mxu0  ;;  %v1008_v31 = vadd.f32 %v3144_v2, %v1007_v58 }
  0xdf   :  { %v2598_v45 = vpop.eup %2597  ;;  %1693 = vadd.xlane.f32.xlu0 %v1692_v43  ;;  %v1368_v46 = vmul.f32 %v2596_v40, %v3159_v27  ;;  %v1494_v54 = vsel %vm1493_vm1, %v1365_v44, 0.0  ;;  %2615 = vtanh.f32 %v995_v49  ;;  %v763_v59 = vadd.f32 %v2400_v57, %v3144_v2  ;;  %v2464_v4 = vpop.f32.mrf.mxu1 }
  0xe0   :  { %v1432_v51 = vmul.f32 %v2598_v45, %v3159_v27  ;;  %v2600_v52 = vpop.eup %2599  ;;  %2617 = vtanh.f32 %v992_v53  ;;  %v1686_v0 = vsel %vm1493_vm1, %v1429_v55, 0.0  ;;  %v1019_v5 = vadd.f32 %v2464_v4, %v3144_v2  ;;  %v754_v10 = vpop.f32.mrf.mxu0 }
  0xe1   :  { %v1503_v50 = vsel %vm1493_vm1, %v1368_v46, 0.0  ;;  %v2602_v56 = vpop.eup %2601  ;;  %v1430_v61 = vmul.f32 %v2600_v52, %v3159_v27  ;;  %2619 = vtanh.f32 %v763_v59  ;;  %v755_v15 = vadd.f32 %v3144_v2, %v754_v10  ;;  %v1010_v20 = vpop.f32.mrf.mxu1 }
  0xe2   :  { %1504 = vadd.xlane.f32.xlu1 %v1503_v50  ;;  %v1695_v60 = vsel %vm1493_vm1, %v1432_v51, 0.0  ;;  %v1366_v1 = vmul.f32 %v2602_v56, %v3159_v27  ;;  %2621 = vtanh.f32 %v760_v63  ;;  %v2403_v14 = vpop.f32.mrf.mxu0  ;;  %v1011_v26 = vadd.f32 %v3144_v2, %v1010_v20 }
  0xe3   :  { %1495 = vadd.xlane.f32.xlu0 %v1494_v54  ;;  %v1689_v6 = vsel %vm1493_vm1, %v1430_v61, 0.0  ;;  %2623 = vtanh.f32 %v1019_v5  ;;  %v2467_v25 = vpop.f32.mrf.mxu1  ;;  %v776_v41 = vadd.f32 %v2403_v14, %v3144_v2 }
  0xe4   :  { %v1497_v11 = vsel %vm1493_vm1, %v1366_v1, 0.0  ;;  %2625 = vtanh.f32 %v1016_v9  ;;  %v767_v24 = vpop.f32.mrf.mxu0  ;;  %v1032_v50 = vadd.f32 %v2467_v25, %v3144_v2 }
  0xe5   :  { %2627 = vtanh.f32 %v755_v15  ;;  %v1023_v36 = vpop.f32.mrf.mxu1 }
  0xe6   :  { %v2604_v62 = vpop.eup %2603  ;;  %1696 = vadd.xlane.f32.xlu1 %v1695_v60  ;;  %2629 = vtanh.f32 %v752_v19  ;;  %v2404_v35 = vpop.f32.mrf.mxu0  ;;  %v768_v60 = vadd.f32 %v3144_v2, %v767_v24 }
  0xe7   :  { %v2606_v3 = vpop.eup %2605  ;;  %1687 = vadd.xlane.f32.xlu0 %v1686_v0  ;;  %v1372_v7 = vmul.f32 %v2604_v62, %v3159_v27  ;;  %2631 = vtanh.f32 %v1011_v26  ;;  %v779_v37 = vadd.f32 %v2404_v35, %v3144_v2  ;;  %v2468_v45 = vpop.f32.mrf.mxu1 }
  0xe8   :  { %v2608_v8 = vpop.eup %2607  ;;  %v1371_v12 = vmul.f32 %v2606_v3, %v3159_v27  ;;  %2633 = vtanh.f32 %v1008_v31  ;;  %v1035_v46 = vadd.f32 %v2468_v45, %v3144_v2  ;;  %v770_v51 = vpop.f32.mrf.mxu0 }
  0xe9   :  { %v2610_v13 = vpop.eup %2609  ;;  %v1515_v16 = vsel %vm1493_vm1, %v1372_v7, 0.0  ;;  %v1436_v17 = vmul.f32 %v2608_v8, %v3159_v27  ;;  %2635 = vtanh.f32 %v779_v37  ;;  %v771_v56 = vadd.f32 %v3144_v2, %v770_v51  ;;  %v1026_v61 = vpop.f32.mrf.mxu1 }
  0xea   :  { %1690 = vadd.xlane.f32.xlu1 %v1689_v6  ;;  %v2612_v18 = vpop.eup %2611  ;;  %v1512_v21 = vsel %vm1493_vm1, %v1371_v12, 0.0  ;;  %v1435_v22 = vmul.f32 %v2610_v13, %v3159_v27  ;;  %2637 = vtanh.f32 %v776_v41  ;;  %v2407_v55 = vpop.f32.mrf.mxu0  ;;  %v1027_v4 = vadd.f32 %v3144_v2, %v1026_v61 }
  0xeb   :  { %1498 = vadd.xlane.f32.xlu0 %v1497_v11  ;;  %v2614_v23 = vpop.eup %2613  ;;  %v1707_v28 = vsel %vm1493_vm1, %v1436_v17, 0.0  ;;  %v1370_v29 = vmul.f32 %v2612_v18, %v3159_v27  ;;  %2639 = vtanh.f32 %v1035_v46  ;;  %v2471_v3 = vpop.f32.mrf.mxu1  ;;  %v1024_v8 = vadd.f32 %v3144_v2, %v1023_v36 }
  0xec   :  { %v2616_v30 = vpop.eup %2615  ;;  %v1704_v32 = vsel %vm1493_vm1, %v1435_v22, 0.0  ;;  %v1369_v33 = vmul.f32 %v2614_v23, %v3159_v27  ;;  %2641 = vtanh.f32 %v1032_v50  ;;  %v783_v1 = vpop.f32.mrf.mxu0  ;;  %v792_v18 = vadd.f32 %v2407_v55, %v3144_v2 }
  0xed   :  { %v2618_v34 = vpop.eup %2617  ;;  %v1509_v38 = vsel %vm1493_vm1, %v1370_v29, 0.0  ;;  %v1434_v39 = vmul.f32 %v2616_v30, %v3159_v27  ;;  %2643 = vtanh.f32 %v771_v56  ;;  %v1039_v13 = vpop.f32.mrf.mxu1 }
  0xee   :  { %1516 = vadd.xlane.f32.xlu1 %v1515_v16  ;;  %v2620_v40 = vpop.eup %2619  ;;  %v1506_v42 = vsel %vm1493_vm1, %v1369_v33, 0.0  ;;  %v1433_v43 = vmul.f32 %v2618_v34, %v3159_v27  ;;  %2645 = vtanh.f32 %v768_v60  ;;  %v2408_v12 = vpop.f32.mrf.mxu0 }
  0xef   :  { %1513 = vadd.xlane.f32.xlu0 %v1512_v21  ;;  %v2622_v44 = vpop.eup %2621  ;;  %v1701_v47 = vsel %vm1493_vm1, %v1434_v39, 0.0  ;;  %v1376_v48 = vmul.f32 %v2620_v40, %v3159_v27  ;;  %2647 = vtanh.f32 %v1027_v4  ;;  %v795_v14 = vadd.f32 %v2408_v12, %v3144_v2  ;;  %v2472_v22 = vpop.f32.mrf.mxu1 }
  0xf0   :  { %v2624_v49 = vpop.eup %2623  ;;  %v1698_v52 = vsel %vm1493_vm1, %v1433_v43, 0.0  ;;  %v1375_v53 = vmul.f32 %v2622_v44, %v3159_v27  ;;  %2649 = vtanh.f32 %v1024_v8  ;;  %v1051_v23 = vadd.f32 %v2472_v22, %v3144_v2  ;;  %v786_v29 = vpop.f32.mrf.mxu0 }
  0xf1   :  { %v2626_v54 = vpop.eup %2625  ;;  %v1527_v57 = vsel %vm1493_vm1, %v1376_v48, 0.0  ;;  %v1440_v58 = vmul.f32 %v2624_v49, %v3159_v27  ;;  %2651 = vtanh.f32 %v795_v14  ;;  %v787_v34 = vadd.f32 %v3144_v2, %v786_v29  ;;  %v1042_v39 = vpop.f32.mrf.mxu1 }
  0xf2   :  { %1708 = vadd.xlane.f32.xlu1 %v1707_v28  ;;  %v2628_v59 = vpop.eup %2627  ;;  %v1524_v62 = vsel %vm1493_vm1, %v1375_v53, 0.0  ;;  %v1439_v63 = vmul.f32 %v2626_v54, %v3159_v27  ;;  %2653 = vtanh.f32 %v792_v18  ;;  %v1048_v28 = vadd.f32 %v2471_v3, %v3144_v2  ;;  %v2411_v33 = vpop.f32.mrf.mxu0 }
  0xf3   :  { %1705 = vadd.xlane.f32.xlu0 %v1704_v32  ;;  %v2630_v0 = vpop.eup %2629  ;;  %v1719_v5 = vsel %vm1493_vm1, %v1440_v58, 0.0  ;;  %v1374_v6 = vmul.f32 %v2628_v59, %v3159_v27  ;;  %2655 = vtanh.f32 %v1051_v23  ;;  %v2475_v44 = vpop.f32.mrf.mxu1  ;;  %v1043_v45 = vadd.f32 %v3144_v2, %v1042_v39 }
  0xf4   :  { %v2632_v7 = vpop.eup %2631  ;;  %v1716_v9 = vsel %vm1493_vm1, %v1439_v63, 0.0  ;;  %v1373_v10 = vmul.f32 %v2630_v0, %v3159_v27  ;;  %2657 = vtanh.f32 %v1048_v28  ;;  %v799_v43 = vpop.f32.mrf.mxu0  ;;  %v1040_v49 = vadd.f32 %v3144_v2, %v1039_v13 }
  0xf5   :  { %v2634_v11 = vpop.eup %2633  ;;  %v1521_v15 = vsel %vm1493_vm1, %v1374_v6, 0.0  ;;  %v1438_v16 = vmul.f32 %v2632_v7, %v3159_v27  ;;  %2659 = vtanh.f32 %v787_v34  ;;  %v1055_v54 = vpop.f32.mrf.mxu1  ;;  %v808_v59 = vadd.f32 %v2411_v33, %v3144_v2 }
  0xf6   :  { %1510 = vadd.xlane.f32.xlu1 %v1509_v38  ;;  %v2636_v17 = vpop.eup %2635  ;;  %v1518_v19 = vsel %vm1493_vm1, %v1373_v10, 0.0  ;;  %v1437_v20 = vmul.f32 %v2634_v11, %v3159_v27  ;;  %v784_v38 = vadd.f32 %v3144_v2, %v783_v1  ;;  %v2412_v53 = vpop.f32.mrf.mxu0 }
  0xf7   :  { %1507 = vadd.xlane.f32.xlu0 %v1506_v42  ;;  %v2638_v21 = vpop.eup %2637  ;;  %v1713_v24 = vsel %vm1493_vm1, %v1438_v16, 0.0  ;;  %v1380_v25 = vmul.f32 %v2636_v17, %v3159_v27  ;;  %v811_v55 = vadd.f32 %v2412_v53, %v3144_v2  ;;  %v2476_v63 = vpop.f32.mrf.mxu1 }
  0xf8   :  { %v2640_v26 = vpop.eup %2639  ;;  %v1710_v30 = vsel %vm1493_vm1, %v1437_v20, 0.0  ;;  %v1379_v31 = vmul.f32 %v2638_v21, %v3159_v27  ;;  %2661 = vtanh.f32 %v784_v38  ;;  %v1067_v0 = vadd.f32 %v2476_v63, %v3144_v2  ;;  %v802_v6 = vpop.f32.mrf.mxu0 }
  0xf9   :  { %v2642_v32 = vpop.eup %2641  ;;  %v1539_v35 = vsel %vm1493_vm1, %v1380_v25, 0.0  ;;  %v1444_v36 = vmul.f32 %v2640_v26, %v3159_v27  ;;  %2663 = vtanh.f32 %v1043_v45  ;;  %v803_v11 = vadd.f32 %v3144_v2, %v802_v6  ;;  %v1058_v16 = vpop.f32.mrf.mxu1 }
  0xfa   :  { %1702 = vadd.xlane.f32.xlu1 %v1701_v47  ;;  %v2644_v37 = vpop.eup %2643  ;;  %v1536_v40 = vsel %vm1493_vm1, %v1379_v31, 0.0  ;;  %v1443_v41 = vmul.f32 %v2642_v32, %v3159_v27  ;;  %2665 = vtanh.f32 %v1040_v49  ;;  %v2415_v10 = vpop.f32.mrf.mxu0  ;;  %v1059_v22 = vadd.f32 %v3144_v2, %v1058_v16 }
  0xfb   :  { %1699 = vadd.xlane.f32.xlu0 %v1698_v52  ;;  %v2646_v42 = vpop.eup %2645  ;;  %v1731_v46 = vsel %vm1493_vm1, %v1444_v36, 0.0  ;;  %v1378_v47 = vmul.f32 %v2644_v37, %v3159_v27  ;;  %2667 = vtanh.f32 %v811_v55  ;;  %v2479_v21 = vpop.f32.mrf.mxu1  ;;  %v1056_v26 = vadd.f32 %v3144_v2, %v1055_v54 }
  0xfc   :  { %v2648_v48 = vpop.eup %2647  ;;  %v1728_v50 = vsel %vm1493_vm1, %v1443_v41, 0.0  ;;  %v1377_v51 = vmul.f32 %v2646_v42, %v3159_v27  ;;  %2669 = vtanh.f32 %v808_v59  ;;  %v815_v20 = vpop.f32.mrf.mxu0  ;;  %v824_v37 = vadd.f32 %v2415_v10, %v3144_v2 }
  0xfd   :  { %v2650_v52 = vpop.eup %2649  ;;  %v1533_v56 = vsel %vm1493_vm1, %v1378_v47, 0.0  ;;  %2671 = vtanh.f32 %v1067_v0  ;;  %v1071_v32 = vpop.f32.mrf.mxu1 }
  0xfe   :  { %1528 = vadd.xlane.f32.xlu1 %v1527_v57  ;;  %v1442_v57 = vmul.f32 %v2648_v48, %v3159_v27  ;;  %v2652_v58 = vpop.eup %2651  ;;  %v1530_v60 = vsel %vm1493_vm1, %v1377_v51, 0.0  ;;  %v1441_v61 = vmul.f32 %v2650_v52, %v3159_v27  ;;  %v2416_v31 = vpop.f32.mrf.mxu0 }
  0xff   :  { %1525 = vadd.xlane.f32.xlu0 %v1524_v62  ;;  %v2654_v62 = vpop.eup %2653  ;;  %v1384_v3 = vmul.f32 %v2652_v58, %v3159_v27  ;;  %v827_v33 = vadd.f32 %v2416_v31, %v3144_v2  ;;  %v2480_v41 = vpop.f32.mrf.mxu1 }
 0x100   :  { %v1725_v1 = vsel %vm1493_vm1, %v1442_v57, 0.0  ;;  %v2656_v4 = vpop.eup %2655  ;;  %v1722_v7 = vsel %vm1493_vm1, %v1441_v61, 0.0  ;;  %v1383_v8 = vmul.f32 %v2654_v62, %v3159_v27  ;;  %v1083_v42 = vadd.f32 %v2480_v41, %v3144_v2  ;;  %v818_v47 = vpop.f32.mrf.mxu0 }
 0x101   :  { %v1551_v12 = vsel %vm1493_vm1, %v1384_v3, 0.0  ;;  %v1448_v13 = vmul.f32 %v2656_v4, %v3159_v27  ;;  %v819_v52 = vadd.f32 %v3144_v2, %v818_v47  ;;  %v1074_v57 = vpop.f32.mrf.mxu1  ;;  %v1072_v4 = vadd.f32 %v3144_v2, %v1071_v32 }
 0x102   :  { %1720 = vadd.xlane.f32.xlu1 %v1719_v5  ;;  %v1064_v5 = vadd.f32 %v2475_v44, %v3144_v2  ;;  %v1548_v17 = vsel %vm1493_vm1, %v1383_v8, 0.0  ;;  %v2419_v51 = vpop.f32.mrf.mxu0  ;;  %v1075_v63 = vadd.f32 %v3144_v2, %v1074_v57 }
 0x103   :  { %1717 = vadd.xlane.f32.xlu0 %v1716_v9  ;;  %v2658_v9 = vpop.eup %2657  ;;  %v1743_v23 = vsel %vm1493_vm1, %v1448_v13, 0.0  ;;  %v2483_v62 = vpop.f32.mrf.mxu1 }
 0x104   :  { %v2660_v14 = vpop.eup %2659  ;;  %2673 = vtanh.f32 %v1064_v5  ;;  %v1447_v18 = vmul.f32 %v2658_v9, %v3159_v27  ;;  %v831_v61 = vpop.f32.mrf.mxu0 }
 0x105   :  { %2675 = vtanh.f32 %v803_v11  ;;  %v1087_v9 = vpop.f32.mrf.mxu1 }
 0x106   :  { %1522 = vadd.xlane.f32.xlu1 %v1521_v15  ;;  %v800_v15 = vadd.f32 %v3144_v2, %v799_v43  ;;  %v1740_v28 = vsel %vm1493_vm1, %v1447_v18, 0.0  ;;  %v2420_v8 = vpop.f32.mrf.mxu0 }
 0x107   :  { %1519 = vadd.xlane.f32.xlu0 %v1518_v19  ;;  %v2662_v19 = vpop.eup %2661  ;;  %v843_v10 = vadd.f32 %v2420_v8, %v3144_v2  ;;  %v2484_v18 = vpop.f32.mrf.mxu1 }
 0x108   :  { %v2664_v25 = vpop.eup %2663  ;;  %2677 = vtanh.f32 %v800_v15  ;;  %v1381_v29 = vmul.f32 %v2662_v19, %v3159_v27  ;;  %v1099_v19 = vadd.f32 %v2484_v18, %v3144_v2 }
 0x109   :  { %2679 = vtanh.f32 %v1059_v22 }
 0x10a   :  { %1714 = vadd.xlane.f32.xlu1 %v1713_v24  ;;  %v1382_v24 = vmul.f32 %v2660_v14, %v3159_v27  ;;  %2681 = vtanh.f32 %v1056_v26  ;;  %v1542_v38 = vsel %vm1493_vm1, %v1381_v29, 0.0  ;;  %v840_v14 = vadd.f32 %v2419_v51, %v3144_v2 }
 0x10b   :  { %1711 = vadd.xlane.f32.xlu0 %v1710_v30  ;;  %v2666_v30 = vpop.eup %2665  ;;  %2683 = vtanh.f32 %v827_v33 }
 0x10c   :  { %v1545_v34 = vsel %vm1493_vm1, %v1382_v24, 0.0  ;;  %v2668_v36 = vpop.eup %2667  ;;  %v1445_v39 = vmul.f32 %v2666_v30, %v3159_v27  ;;  %2685 = vtanh.f32 %v824_v37  ;;  %v834_v24 = vpop.f32.mrf.mxu0 }
 0x10d   :  { %v1388_v44 = vmul.f32 %v2668_v36, %v3159_v27  ;;  %2687 = vtanh.f32 %v1083_v42  ;;  %v835_v30 = vadd.f32 %v3144_v2, %v834_v24 }
 0x10e   :  { %1540 = vadd.xlane.f32.xlu1 %v1539_v35  ;;  %v1446_v35 = vmul.f32 %v2664_v25, %v3159_v27  ;;  %v1734_v48 = vsel %vm1493_vm1, %v1445_v39, 0.0  ;;  %v2423_v29 = vpop.f32.mrf.mxu0 }
 0x10f   :  { %1537 = vadd.xlane.f32.xlu0 %v1536_v40  ;;  %v2670_v40 = vpop.eup %2669  ;;  %v1563_v53 = vsel %vm1493_vm1, %v1388_v44, 0.0 }
 0x110   :  { %v1737_v43 = vsel %vm1493_vm1, %v1446_v35, 0.0  ;;  %v2672_v45 = vpop.eup %2671  ;;  %v1387_v49 = vmul.f32 %v2670_v40, %v3159_v27  ;;  %v1090_v35 = vpop.f32.mrf.mxu1 }
 0x111   :  { %v1452_v54 = vmul.f32 %v2672_v45, %v3159_v27  ;;  %v847_v39 = vpop.f32.mrf.mxu0  ;;  %v1091_v41 = vadd.f32 %v3144_v2, %v1090_v35  ;;  %v1088_v45 = vadd.f32 %v3144_v2, %v1087_v9 }
 0x112   :  { %1732 = vadd.xlane.f32.xlu1 %v1731_v46  ;;  %v1080_v46 = vadd.f32 %v2479_v21, %v3144_v2  ;;  %v1560_v58 = vsel %vm1493_vm1, %v1387_v49, 0.0  ;;  %v2487_v40 = vpop.f32.mrf.mxu1 }
 0x113   :  { %1729 = vadd.xlane.f32.xlu0 %v1728_v50  ;;  %v2674_v50 = vpop.eup %2673  ;;  %v1755_v0 = vsel %vm1493_vm1, %v1452_v54, 0.0  ;;  %v2424_v49 = vpop.f32.mrf.mxu0 }
 0x114   :  { %v2676_v55 = vpop.eup %2675  ;;  %2689 = vtanh.f32 %v1080_v46  ;;  %v1451_v59 = vmul.f32 %v2674_v50, %v3159_v27  ;;  %v1103_v50 = vpop.f32.mrf.mxu1  ;;  %v859_v51 = vadd.f32 %v2424_v49, %v3144_v2 }
 0x115   :  { %2691 = vtanh.f32 %v819_v52 }
 0x116   :  { %1534 = vadd.xlane.f32.xlu1 %v1533_v56  ;;  %v816_v56 = vadd.f32 %v3144_v2, %v815_v20  ;;  %v1752_v5 = vsel %vm1493_vm1, %v1451_v59, 0.0  ;;  %v2488_v59 = vpop.f32.mrf.mxu1 }
 0x117   :  { %1531 = vadd.xlane.f32.xlu0 %v1530_v60  ;;  %v2678_v60 = vpop.eup %2677 }
 0x118   :  { %v2680_v3 = vpop.eup %2679  ;;  %2693 = vtanh.f32 %v816_v56  ;;  %v1385_v6 = vmul.f32 %v2678_v60, %v3159_v27  ;;  %v1115_v60 = vadd.f32 %v2488_v59, %v3144_v2  ;;  %v3366_v59 = vld [vmem:[%s3829_s2] ss:$0 sm:$0xff] }
 0x119   :  { %2695 = vtanh.f32 %v1075_v63 }
 0x11a   :  { %1726 = vadd.xlane.f32.xlu1 %v1725_v1  ;;  %v1386_v1 = vmul.f32 %v2676_v55, %v3159_v27  ;;  %2697 = vtanh.f32 %v1072_v4  ;;  %v1554_v15 = vsel %vm1493_vm1, %v1385_v6, 0.0  ;;  %v856_v55 = vadd.f32 %v2423_v29, %v3144_v2 }
 0x11b   :  { %1723 = vadd.xlane.f32.xlu0 %v1722_v7  ;;  %v2682_v7 = vpop.eup %2681  ;;  %2699 = vtanh.f32 %v843_v10 }
 0x11c   :  { %v1557_v11 = vsel %vm1493_vm1, %v1386_v1, 0.0  ;;  %v2684_v13 = vpop.eup %2683  ;;  %v1449_v16 = vmul.f32 %v2682_v7, %v3159_v27  ;;  %2701 = vtanh.f32 %v840_v14  ;;  %v850_v1 = vpop.f32.mrf.mxu0 }
 0x11d   :  { %v1392_v21 = vmul.f32 %v2684_v13, %v3159_v27  ;;  %2703 = vtanh.f32 %v1099_v19  ;;  %v851_v7 = vadd.f32 %v3144_v2, %v850_v1 }
 0x11e   :  { %1552 = vadd.xlane.f32.xlu1 %v1551_v12  ;;  %v1450_v12 = vmul.f32 %v2680_v3, %v3159_v27  ;;  %v1746_v25 = vsel %vm1493_vm1, %v1449_v16, 0.0  ;;  %v2427_v6 = vpop.f32.mrf.mxu0 }
 0x11f   :  { %1549 = vadd.xlane.f32.xlu0 %v1548_v17  ;;  %v2686_v17 = vpop.eup %2685  ;;  %v1575_v31 = vsel %vm1493_vm1, %v1392_v21, 0.0 }
 0x120   :  { %v1749_v20 = vsel %vm1493_vm1, %v1450_v12, 0.0  ;;  %v2688_v22 = vpop.eup %2687  ;;  %v1391_v26 = vmul.f32 %v2686_v17, %v3159_v27  ;;  %v1106_v12 = vpop.f32.mrf.mxu1 }
 0x121   :  { %v1456_v32 = vmul.f32 %v2688_v22, %v3159_v27  ;;  %v863_v16 = vpop.f32.mrf.mxu0  ;;  %v1107_v18 = vadd.f32 %v3144_v2, %v1106_v12  ;;  %v1104_v22 = vadd.f32 %v3144_v2, %v1103_v50 }
 0x122   :  { %1744 = vadd.xlane.f32.xlu1 %v1743_v23  ;;  %v1096_v23 = vadd.f32 %v2483_v62, %v3144_v2  ;;  %v1572_v36 = vsel %vm1493_vm1, %v1391_v26, 0.0  ;;  %v2491_v17 = vpop.f32.mrf.mxu1 }
 0x123   :  { %1741 = vadd.xlane.f32.xlu0 %v1740_v28  ;;  %v2690_v28 = vpop.eup %2689  ;;  %v1767_v42 = vsel %vm1493_vm1, %v1456_v32, 0.0  ;;  %v2428_v26 = vpop.f32.mrf.mxu0 }
 0x124   :  { %v2692_v33 = vpop.eup %2691  ;;  %2705 = vtanh.f32 %v1096_v23  ;;  %v1455_v37 = vmul.f32 %v2690_v28, %v3159_v27  ;;  %v1119_v28 = vpop.f32.mrf.mxu1  ;;  %v875_v29 = vadd.f32 %v2428_v26, %v3144_v2 }
 0x125   :  { %2707 = vtanh.f32 %v835_v30 }
 0x126   :  { %1546 = vadd.xlane.f32.xlu1 %v1545_v34  ;;  %v832_v34 = vadd.f32 %v3144_v2, %v831_v61  ;;  %v1764_v46 = vsel %vm1493_vm1, %v1455_v37, 0.0  ;;  %v2492_v37 = vpop.f32.mrf.mxu1 }
 0x127   :  { %1543 = vadd.xlane.f32.xlu0 %v1542_v38  ;;  %v2694_v38 = vpop.eup %2693 }
 0x128   :  { %v2696_v44 = vpop.eup %2695  ;;  %2709 = vtanh.f32 %v832_v34  ;;  %v1389_v47 = vmul.f32 %v2694_v38, %v3159_v27  ;;  %v1131_v38 = vadd.f32 %v2492_v37, %v3144_v2 }
 0x129   :  { %2711 = vtanh.f32 %v1091_v41 }
 0x12a   :  { %1738 = vadd.xlane.f32.xlu1 %v1737_v43  ;;  %v1390_v43 = vmul.f32 %v2692_v33, %v3159_v27  ;;  %2713 = vtanh.f32 %v1088_v45  ;;  %v1566_v56 = vsel %vm1493_vm1, %v1389_v47, 0.0  ;;  %v872_v33 = vadd.f32 %v2427_v6, %v3144_v2 }
 0x12b   :  { %1735 = vadd.xlane.f32.xlu0 %v1734_v48  ;;  %v2698_v48 = vpop.eup %2697  ;;  %2715 = vtanh.f32 %v859_v51 }
 0x12c   :  { %v1569_v52 = vsel %vm1493_vm1, %v1390_v43, 0.0  ;;  %v2700_v54 = vpop.eup %2699  ;;  %v1453_v57 = vmul.f32 %v2698_v48, %v3159_v27  ;;  %2717 = vtanh.f32 %v856_v55  ;;  %v866_v43 = vpop.f32.mrf.mxu0 }
 0x12d   :  { %v1396_v62 = vmul.f32 %v2700_v54, %v3159_v27  ;;  %2719 = vtanh.f32 %v1115_v60  ;;  %v867_v48 = vadd.f32 %v3144_v2, %v866_v43 }
 0x12e   :  { %1564 = vadd.xlane.f32.xlu1 %v1563_v53  ;;  %v1454_v53 = vmul.f32 %v2696_v44, %v3159_v27  ;;  %v1758_v3 = vsel %vm1493_vm1, %v1453_v57, 0.0  ;;  %v2431_v47 = vpop.f32.mrf.mxu0 }
 0x12f   :  { %1561 = vadd.xlane.f32.xlu0 %v1560_v58  ;;  %v2702_v58 = vpop.eup %2701  ;;  %v1587_v8 = vsel %vm1493_vm1, %v1396_v62, 0.0 }
 0x130   :  { %v1761_v61 = vsel %vm1493_vm1, %v1454_v53, 0.0  ;;  %v2704_v63 = vpop.eup %2703  ;;  %v1395_v4 = vmul.f32 %v2702_v58, %v3159_v27  ;;  %v1122_v53 = vpop.f32.mrf.mxu1 }
 0x131   :  { %v1460_v9 = vmul.f32 %v2704_v63, %v3159_v27  ;;  %v879_v57 = vpop.f32.mrf.mxu0  ;;  %v1123_v60 = vadd.f32 %v3366_v59, %v1122_v53  ;;  %v1120_v63 = vadd.f32 %v3366_v59, %v1119_v28 }
 0x132   :  { %1756 = vadd.xlane.f32.xlu1 %v1755_v0  ;;  %v1112_v0 = vadd.f32 %v2487_v40, %v3144_v2  ;;  %v1584_v13 = vsel %vm1493_vm1, %v1395_v4, 0.0  ;;  %v2495_v58 = vpop.f32.mrf.mxu1 }
 0x133   :  { %1753 = vadd.xlane.f32.xlu0 %v1752_v5  ;;  %v2706_v5 = vpop.eup %2705  ;;  %v1779_v19 = vsel %vm1493_vm1, %v1460_v9, 0.0  ;;  %v2432_v4 = vpop.f32.mrf.mxu0 }
 0x134   :  { %v2708_v10 = vpop.eup %2707  ;;  %2721 = vtanh.f32 %v1112_v0  ;;  %v1459_v14 = vmul.f32 %v2706_v5, %v3159_v27  ;;  %v1135_v5 = vpop.f32.mrf.mxu1  ;;  %v891_v6 = vadd.f32 %v3366_v59, %v2432_v4 }
 0x135   :  { %2723 = vtanh.f32 %v851_v7 }
 0x136   :  { %1558 = vadd.xlane.f32.xlu1 %v1557_v11  ;;  %v848_v11 = vadd.f32 %v3144_v2, %v847_v39  ;;  %v1776_v23 = vsel %vm1493_vm1, %v1459_v14, 0.0 }
 0x137   :  { %1555 = vadd.xlane.f32.xlu0 %v1554_v15  ;;  %v2710_v15 = vpop.eup %2709 }
 0x138   :  { %v2712_v21 = vpop.eup %2711  ;;  %2725 = vtanh.f32 %v848_v11  ;;  %v1393_v24 = vmul.f32 %v2710_v15, %v3159_v27 }
 0x139   :  { %2727 = vtanh.f32 %v1107_v18 }
 0x13a   :  { %1750 = vadd.xlane.f32.xlu1 %v1749_v20  ;;  %v1394_v20 = vmul.f32 %v2708_v10, %v3159_v27  ;;  %2729 = vtanh.f32 %v1104_v22  ;;  %v1578_v34 = vsel %vm1493_vm1, %v1393_v24, 0.0  ;;  %v888_v10 = vadd.f32 %v3366_v59, %v2431_v47  ;;  %v882_v22 = vpop.f32.mrf.mxu0  ;;  %v3392_v24 = vld [vmem:[%s3830_s3] ss:$0 sm:$0xff] }
 0x13b   :  { %1747 = vadd.xlane.f32.xlu0 %v1746_v25  ;;  %v2714_v25 = vpop.eup %2713  ;;  %2731 = vtanh.f32 %v875_v29  ;;  %v1136_v47 = vadd.f32 %v3366_v59, %v1135_v5 }
 0x13c   :  { %v1581_v30 = vsel %vm1493_vm1, %v1394_v20, 0.0  ;;  %v2716_v32 = vpop.eup %2715  ;;  %v1457_v35 = vmul.f32 %v2714_v25, %v3159_v27  ;;  %2733 = vtanh.f32 %v872_v33  ;;  %v2435_v29 = vpop.f32.mrf.mxu0 }
 0x13d   :  { %v1400_v40 = vmul.f32 %v2716_v32, %v3159_v27  ;;  %2735 = vtanh.f32 %v1131_v38 }
 0x13e   :  { %1576 = vadd.xlane.f32.xlu1 %v1575_v31  ;;  %v1458_v31 = vmul.f32 %v2712_v21, %v3159_v27  ;;  %v1770_v44 = vsel %vm1493_vm1, %v1457_v35, 0.0  ;;  %v1144_v21 = vadd.f32 %v3366_v59, %v2495_v58  ;;  %v880_v35 = vadd.f32 %v3366_v59, %v879_v57 }
 0x13f   :  { %1573 = vadd.xlane.f32.xlu0 %v1572_v36  ;;  %v2718_v36 = vpop.eup %2717  ;;  %v1599_v49 = vsel %vm1493_vm1, %v1400_v40, 0.0 }
 0x140   :  { %v1773_v39 = vsel %vm1493_vm1, %v1458_v31, 0.0  ;;  %v2720_v41 = vpop.eup %2719  ;;  %v1399_v45 = vmul.f32 %v2718_v36, %v3159_v27 }
 0x141   :  { %v1464_v50 = vmul.f32 %v2720_v41, %v3159_v27 }
 0x142   :  { %1768 = vadd.xlane.f32.xlu1 %v1767_v42  ;;  %v1128_v42 = vadd.f32 %v2491_v17, %v3144_v2  ;;  %v1596_v54 = vsel %vm1493_vm1, %v1399_v45, 0.0 }
 0x143   :  { %1765 = vadd.xlane.f32.xlu0 %v1764_v46  ;;  %v2722_v46 = vpop.eup %2721 }
 0x144   :  { %v2724_v51 = vpop.eup %2723  ;;  %2737 = vtanh.f32 %v1128_v42  ;;  %v1463_v55 = vmul.f32 %v2722_v46, %v3159_v27  ;;  %v895_v42 = vpop.f32.mrf.mxu0 }
 0x145   :  { %2739 = vtanh.f32 %v867_v48 }
 0x146   :  { %1570 = vadd.xlane.f32.xlu1 %v1569_v52  ;;  %v864_v52 = vadd.f32 %v3144_v2, %v863_v16  ;;  %v1791_v2 = vsel %vm1493_vm1, %v1464_v50, 0.0  ;;  %v1788_v0 = vsel %vm1493_vm1, %v1463_v55, 0.0  ;;  %v2496_v16 = vpop.f32.mrf.mxu1 }
 0x147   :  { %1567 = vadd.xlane.f32.xlu0 %v1566_v56  ;;  %v2726_v56 = vpop.eup %2725  ;;  %v1147_v17 = vadd.f32 %v3366_v59, %v2496_v16 }
 0x148   :  { %v2728_v62 = vpop.eup %2727  ;;  %2741 = vtanh.f32 %v864_v52  ;;  %v1397_v1 = vmul.f32 %v2726_v56, %v3159_v27  ;;  %v1138_v31 = vpop.f32.mrf.mxu1 }
 0x149   :  { %2743 = vtanh.f32 %v1123_v60  ;;  %v1139_v43 = vadd.f32 %v3366_v59, %v1138_v31  ;;  %v904_v60 = vadd.f32 %v3366_v59, %v2435_v29 }
 0x14a   :  { %1762 = vadd.xlane.f32.xlu1 %v1761_v61  ;;  %v1398_v61 = vmul.f32 %v2724_v51, %v3159_v27  ;;  %2745 = vtanh.f32 %v1120_v63  ;;  %v1590_v11 = vsel %vm1493_vm1, %v1397_v1, 0.0  ;;  %v2499_v40 = vpop.f32.mrf.mxu1 }
 0x14b   :  { %1759 = vadd.xlane.f32.xlu0 %v1758_v3  ;;  %v2730_v3 = vpop.eup %2729  ;;  %2747 = vtanh.f32 %v891_v6 }
 0x14c   :  { %v1593_v7 = vsel %vm1493_vm1, %v1398_v61, 0.0  ;;  %v2732_v9 = vpop.eup %2731  ;;  %v1461_v12 = vmul.f32 %v2730_v3, %v3159_v27  ;;  %2749 = vtanh.f32 %v888_v10  ;;  %v1151_v52 = vpop.f32.mrf.mxu1 }
 0x14d   :  { %2751 = vtanh.f32 %v1147_v17 }
 0x14e   :  { %1588 = vadd.xlane.f32.xlu1 %v1587_v8  ;;  %v1462_v8 = vmul.f32 %v2728_v62, %v3159_v27  ;;  %2753 = vtanh.f32 %v1144_v21  ;;  %v2500_v1 = vpop.f32.mrf.mxu1 }
 0x14f   :  { %1585 = vadd.xlane.f32.xlu0 %v1584_v13  ;;  %v2734_v13 = vpop.eup %2733  ;;  %v1163_v3 = vadd.f32 %v3366_v59, %v2500_v1 }
 0x150   :  { %v1785_v18 = vsel %vm1493_vm1, %v1462_v8, 0.0  ;;  %v2736_v20 = vpop.eup %2735  ;;  %v1403_v25 = vmul.f32 %v3392_v24, %v2734_v13 }
 0x151   :  { %v2738_v26 = vpop.eup %2737  ;;  %v1468_v33 = vmul.f32 %v3392_v24, %v2736_v20 }
 0x152   :  { %1780 = vadd.xlane.f32.xlu1 %v1779_v19  ;;  %v1404_v19 = vmul.f32 %v2732_v9, %v3159_v27  ;;  %v1608_v36 = vsel %vm1493_vm1, %v1403_v25, 0.0  ;;  %v1467_v37 = vmul.f32 %v3392_v24, %v2738_v26 }
 0x153   :  { %1777 = vadd.xlane.f32.xlu0 %v1776_v23  ;;  %v1782_v23 = vsel %vm1493_vm1, %v1461_v12, 0.0 }
 0x154   :  { %v1611_v32 = vsel %vm1493_vm1, %v1404_v19, 0.0  ;;  %v1800_v48 = vsel %vm1493_vm1, %v1467_v37, 0.0  ;;  %v1152_v37 = vadd.f32 %v3366_v59, %v1151_v52 }
 0x156   :  { %1582 = vadd.xlane.f32.xlu1 %v1581_v30  ;;  %v883_v30 = vadd.f32 %v3366_v59, %v882_v22  ;;  %v896_v22 = vadd.f32 %v3366_v59, %v895_v42 }
 0x157   :  { %1579 = vadd.xlane.f32.xlu0 %v1578_v34  ;;  %v2740_v34 = vpop.eup %2739 }
 0x158   :  { %v2742_v38 = vpop.eup %2741  ;;  %2755 = vtanh.f32 %v883_v30  ;;  %v1402_v45 = vmul.f32 %v3392_v24, %v2740_v34 }
 0x159   :  { %v2744_v46 = vpop.eup %2743  ;;  %2757 = vtanh.f32 %v880_v35 }
 0x15a   :  { %1774 = vadd.xlane.f32.xlu1 %v1773_v39  ;;  %v2746_v50 = vpop.eup %2745  ;;  %2759 = vtanh.f32 %v1139_v43  ;;  %v1605_v56 = vsel %vm1493_vm1, %v1402_v45, 0.0  ;;  %v1466_v57 = vmul.f32 %v3392_v24, %v2744_v46 }
 0x15b   :  { %1771 = vadd.xlane.f32.xlu0 %v1770_v44  ;;  %v1803_v44 = vsel %vm1493_vm1, %v1468_v33, 0.0  ;;  %v2748_v58 = vpop.eup %2747  ;;  %2761 = vtanh.f32 %v1136_v47  ;;  %v1465_v61 = vmul.f32 %v3392_v24, %v2746_v50 }
 0x15c   :  { %v2750_v62 = vpop.eup %2749  ;;  %v1797_v4 = vsel %vm1493_vm1, %v1466_v57, 0.0  ;;  %v1408_v5 = vmul.f32 %v3392_v24, %v2748_v58 }
 0x15d   :  { %v2752_v6 = vpop.eup %2751  ;;  %v1794_v9 = vsel %vm1493_vm1, %v1465_v61, 0.0  ;;  %v1407_v10 = vmul.f32 %v3392_v24, %v2750_v62 }
 0x15e   :  { %1600 = vadd.xlane.f32.xlu1 %v1599_v49  ;;  %v1401_v49 = vmul.f32 %v3392_v24, %v2742_v38  ;;  %v1623_v19 = vsel %vm1493_vm1, %v1408_v5, 0.0  ;;  %v1472_v20 = vmul.f32 %v3392_v24, %v2752_v6 }
 0x15f   :  { %1597 = vadd.xlane.f32.xlu0 %v1596_v54  ;;  %v2436_v54 = vpop.f32.mrf.mxu0 }
 0x160   :  { %v907_v55 = vadd.f32 %v3366_v59, %v2436_v54  ;;  %v1815_v34 = vsel %vm1493_vm1, %v1472_v20, 0.0 }
 0x161   :  { %v898_v8 = vpop.f32.mrf.mxu0 }
 0x162   :  { %1792 = vadd.xlane.f32.xlu1 %v1791_v2  ;;  %v1602_v2 = vsel %vm1493_vm1, %v1401_v49, 0.0  ;;  %2763 = vtanh.f32 %v907_v55  ;;  %v899_v17 = vadd.f32 %v3366_v59, %v898_v8 }
 0x163   :  { %1789 = vadd.xlane.f32.xlu0 %v1788_v0  ;;  %2765 = vtanh.f32 %v904_v60  ;;  %v2439_v16 = vpop.f32.mrf.mxu0 }
 0x164   :  { %2767 = vtanh.f32 %v1163_v3  ;;  %v920_v52 = vadd.f32 %v3366_v59, %v2439_v16 }
 0x166   :  { %1594 = vadd.xlane.f32.xlu1 %v1593_v7  ;;  %v1160_v7 = vadd.f32 %v3366_v59, %v2499_v40 }
 0x167   :  { %1591 = vadd.xlane.f32.xlu0 %v1590_v11  ;;  %v3380_v14 = vpop.xlane.xlu1 %1501  ;;  %v2754_v11 = vpop.eup %2753 }
 0x168   :  { %v3382_v15 = vpop.xlane.xlu0 %1693  ;;  %v2756_v21 = vpop.eup %2755  ;;  %2769 = vtanh.f32 %v1160_v7  ;;  %v1471_v25 = vmul.f32 %v3392_v24, %v2754_v11 }
 0x169   :  { %v2758_v26 = vpop.eup %2757  ;;  %2771 = vtanh.f32 %v899_v17  ;;  %v1406_v35 = vmul.f32 %v3392_v24, %v2756_v21 }
 0x16a   :  { %1786 = vadd.xlane.f32.xlu1 %v1785_v18  ;;  %v1154_v18 = vpop.f32.mrf.mxu1  ;;  %2773 = vtanh.f32 %v896_v22  ;;  %v1812_v38 = vsel %vm1493_vm1, %v1471_v25, 0.0  ;;  %v1405_v40 = vmul.f32 %v3392_v24, %v2758_v26 }
 0x16b   :  { %1783 = vadd.xlane.f32.xlu0 %v1782_v23  ;;  %v3395_v28 = vpop.xlane.xlu1 %1504  ;;  %v1620_v23 = vsel %vm1493_vm1, %v1407_v10, 0.0  ;;  %v1155_v33 = vadd.f32 %v3366_v59, %v1154_v18 }
 0x16c   :  { %v3397_v27 = vpop.xlane.xlu0 %1495  ;;  %v2503_v30 = vpop.f32.mrf.mxu1  ;;  %v1614_v54 = vsel %vm1493_vm1, %v1405_v40, 0.0 }
 0x16d   :  { %2775 = vtanh.f32 %v1155_v33  ;;  %v1176_v3 = vadd.f32 %v3366_v59, %v2503_v30 }
 0x16e   :  { %1612 = vadd.xlane.f32.xlu1 %v1611_v32  ;;  %v911_v32 = vpop.f32.mrf.mxu0  ;;  %2777 = vtanh.f32 %v1152_v37 }
 0x16f   :  { %1609 = vadd.xlane.f32.xlu0 %v1608_v36  ;;  %v3405_v39 = vpop.xlane.xlu1 %1696  ;;  %v2760_v36 = vpop.eup %2759  ;;  %v912_v20 = vadd.f32 %v3366_v59, %v911_v32 }
 0x170   :  { %v3407_v41 = vpop.xlane.xlu0 %1687  ;;  %v2762_v42 = vpop.eup %2761  ;;  %v1470_v49 = vmul.f32 %v3392_v24, %v2760_v36 }
 0x171   :  { %v2440_v46 = vpop.f32.mrf.mxu0  ;;  %v2764_v50 = vpop.eup %2763  ;;  %v1469_v55 = vmul.f32 %v3392_v24, %v2762_v42 }
 0x172   :  { %1804 = vadd.xlane.f32.xlu1 %v1803_v44  ;;  %v1167_v44 = vpop.f32.mrf.mxu1  ;;  %v923_v47 = vadd.f32 %v3366_v59, %v2440_v46  ;;  %v1809_v61 = vsel %vm1493_vm1, %v1470_v49, 0.0  ;;  %v1412_v62 = vmul.f32 %v3392_v24, %v2764_v50 }
 0x173   :  { %1801 = vadd.xlane.f32.xlu0 %v1800_v48  ;;  %v3415_v51 = vpop.xlane.xlu1 %1690  ;;  %v1617_v48 = vsel %vm1493_vm1, %v1406_v35, 0.0  ;;  %v1806_v5 = vsel %vm1493_vm1, %v1469_v55, 0.0  ;;  %v1168_v37 = vadd.f32 %v3366_v59, %v1167_v44 }
 0x174   :  { %v3417_v53 = vpop.xlane.xlu0 %1498  ;;  %v2504_v60 = vpop.f32.mrf.mxu1  ;;  %2779 = vtanh.f32 %v923_v47  ;;  %v1635_v17 = vsel %vm1493_vm1, %v1412_v62, 0.0 }
 0x175   :  { %2781 = vtanh.f32 %v920_v52 }
 0x176   :  { %1606 = vadd.xlane.f32.xlu1 %v1605_v56  ;;  %v2766_v56 = vpop.eup %2765  ;;  %v1170_v16 = vpop.f32.mrf.mxu1 }
 0x177   :  { %1603 = vadd.xlane.f32.xlu0 %v1602_v2  ;;  %v3425_v63 = vpop.xlane.xlu1 %1516  ;;  %v1179_v2 = vadd.f32 %v3366_v59, %v2504_v60  ;;  %v2768_v1 = vpop.eup %2767  ;;  %v1411_v6 = vmul.f32 %v3392_v24, %v2766_v56 }
 0x178   :  { %v3427_v0 = vpop.xlane.xlu0 %1513  ;;  %v2770_v7 = vpop.eup %2769  ;;  %v1476_v18 = vmul.f32 %v3392_v24, %v2768_v1 }
 0x179   :  { %2783 = vtanh.f32 %v1179_v2  ;;  %v1632_v21 = vsel %vm1493_vm1, %v1411_v6, 0.0  ;;  %v1475_v22 = vmul.f32 %v3392_v24, %v2770_v7  ;;  %v2507_v26 = vpop.f32.mrf.mxu1 }
 0x17a   :  { %1798 = vadd.xlane.f32.xlu1 %v1797_v4  ;;  %v914_v4 = vpop.f32.mrf.mxu0  ;;  %2785 = vtanh.f32 %v1176_v3  ;;  %v1827_v35 = vsel %vm1493_vm1, %v1476_v18, 0.0 }
 0x17b   :  { %1795 = vadd.xlane.f32.xlu0 %v1794_v9  ;;  %v3435_v12 = vpop.xlane.xlu1 %1708  ;;  %v915_v11 = vadd.f32 %v3366_v59, %v914_v4  ;;  %v1183_v47 = vpop.f32.mrf.mxu1 }
 0x17c   :  { %v3437_v13 = vpop.xlane.xlu0 %1705  ;;  %v2443_v10 = vpop.f32.mrf.mxu0 }
 0x17d   :  { %2787 = vtanh.f32 %v915_v11  ;;  %v936_v55 = vadd.f32 %v3366_v59, %v2443_v10  ;;  %v2508_v1 = vpop.f32.mrf.mxu1  ;;  %v1192_v10 = vadd.f32 %v3366_v59, %v2507_v26 }
 0x17e   :  { %1624 = vadd.xlane.f32.xlu1 %v1623_v19  ;;  %v2772_v19 = vpop.eup %2771  ;;  %v927_v33 = vpop.f32.mrf.mxu0  ;;  %2789 = vtanh.f32 %v912_v20  ;;  %v1195_v4 = vadd.f32 %v3366_v59, %v2508_v1 }
 0x17f   :  { %1621 = vadd.xlane.f32.xlu0 %v1620_v23  ;;  %v3445_v29 = vpop.xlane.xlu1 %1510  ;;  %v2774_v23 = vpop.eup %2773  ;;  %v1410_v32 = vmul.f32 %v3392_v24, %v2772_v19 }
 0x180   :  { %v3447_v31 = vpop.xlane.xlu0 %1507  ;;  %v2776_v36 = vpop.eup %2775  ;;  %v1409_v40 = vmul.f32 %v3392_v24, %v2774_v23 }
 0x181   :  { %v2778_v42 = vpop.eup %2777  ;;  %v2444_v49 = vpop.f32.mrf.mxu0  ;;  %v1629_v52 = vsel %vm1493_vm1, %v1410_v32, 0.0  ;;  %v1474_v44 = vmul.f32 %v3392_v24, %v2776_v36 }
 0x182   :  { %1816 = vadd.xlane.f32.xlu1 %v1815_v34  ;;  %v1171_v34 = vadd.f32 %v3366_v59, %v1170_v16  ;;  %v939_v50 = vadd.f32 %v3366_v59, %v2444_v49  ;;  %v1626_v56 = vsel %vm1493_vm1, %v1409_v40, 0.0  ;;  %v1473_v60 = vmul.f32 %v3392_v24, %v2778_v42 }
 0x183   :  { %1813 = vadd.xlane.f32.xlu0 %v1812_v38  ;;  %v3455_v43 = vpop.xlane.xlu1 %1702  ;;  %v1824_v38 = vsel %vm1493_vm1, %v1475_v22, 0.0  ;;  %v930_v3 = vpop.f32.mrf.mxu0 }
 0x184   :  { %v3457_v45 = vpop.xlane.xlu0 %1699  ;;  %2791 = vtanh.f32 %v1171_v34  ;;  %v1818_v11 = vsel %vm1493_vm1, %v1473_v60, 0.0  ;;  %v1186_v22 = vpop.f32.mrf.mxu1 }
 0x185   :  { %2793 = vtanh.f32 %v1168_v37  ;;  %v2447_v19 = vpop.f32.mrf.mxu0 }
 0x186   :  { %1618 = vadd.xlane.f32.xlu1 %v1617_v48  ;;  %2795 = vtanh.f32 %v939_v50  ;;  %v2511_v40 = vpop.f32.mrf.mxu1  ;;  %v1187_v50 = vadd.f32 %v3366_v59, %v1186_v22 }
 0x187   :  { %1615 = vadd.xlane.f32.xlu0 %v1614_v54  ;;  %v3465_v57 = vpop.xlane.xlu1 %1528  ;;  %v2780_v54 = vpop.eup %2779  ;;  %2797 = vtanh.f32 %v936_v55 }
 0x188   :  { %v3467_v58 = vpop.xlane.xlu0 %1525  ;;  %v2782_v2 = vpop.eup %2781  ;;  %v1416_v6 = vmul.f32 %v3392_v24, %v2780_v54  ;;  %2799 = vtanh.f32 %v1195_v4  ;;  %v1184_v54 = vadd.f32 %v3366_v59, %v1183_v47  ;;  %v952_v47 = vadd.f32 %v3366_v59, %v2447_v19 }
 0x189   :  { %v2784_v7 = vpop.eup %2783  ;;  %v1415_v16 = vmul.f32 %v3392_v24, %v2782_v2  ;;  %2801 = vtanh.f32 %v1192_v10  ;;  %v1199_v2 = vpop.f32.mrf.mxu1 }
 0x18a   :  { %1810 = vadd.xlane.f32.xlu1 %v1809_v61  ;;  %v1647_v23 = vsel %vm1493_vm1, %v1416_v6, 0.0  ;;  %v1480_v26 = vmul.f32 %v3392_v24, %v2784_v7 }
 0x18b   :  { %1807 = vadd.xlane.f32.xlu0 %v1806_v5  ;;  %v3475_v8 = vpop.xlane.xlu1 %1720  ;;  %v1821_v5 = vsel %vm1493_vm1, %v1474_v44, 0.0  ;;  %v1644_v32 = vsel %vm1493_vm1, %v1415_v16, 0.0  ;;  %v2512_v22 = vpop.f32.mrf.mxu1 }
 0x18c   :  { %v3477_v9 = vpop.xlane.xlu0 %1717 }
 0x18e   :  { %1636 = vadd.xlane.f32.xlu1 %v1635_v17  ;;  %v2786_v17 = vpop.eup %2785 }
 0x18f   :  { %1633 = vadd.xlane.f32.xlu0 %v1632_v21  ;;  %v3485_v25 = vpop.xlane.xlu1 %1522  ;;  %v931_v21 = vadd.f32 %v3366_v59, %v930_v3  ;;  %v2788_v34 = vpop.eup %2787  ;;  %v1479_v36 = vmul.f32 %v3392_v24, %v2786_v17 }
 0x190   :  { %v3487_v30 = vpop.xlane.xlu0 %1519  ;;  %v2790_v37 = vpop.eup %2789 }
 0x191   :  { %2803 = vtanh.f32 %v931_v21  ;;  %v2792_v44 = vpop.eup %2791  ;;  %v1836_v55 = vsel %vm1493_vm1, %v1479_v36, 0.0 }
 0x192   :  { %1828 = vadd.xlane.f32.xlu1 %v1827_v35  ;;  %v928_v35 = vadd.f32 %v3366_v59, %v927_v33  ;;  %v1414_v33 = vmul.f32 %v3392_v24, %v2788_v34  ;;  %v2794_v60 = vpop.eup %2793  ;;  %v1478_v6 = vmul.f32 %v3392_v24, %v2792_v44 }
 0x193   :  { %1825 = vadd.xlane.f32.xlu0 %v1824_v38  ;;  %v3495_v46 = vpop.xlane.xlu1 %1714  ;;  %v943_v38 = vpop.f32.mrf.mxu0  ;;  %v1477_v16 = vmul.f32 %v3392_v24, %v2794_v60 }
 0x194   :  { %v3497_v48 = vpop.xlane.xlu0 %1711  ;;  %2805 = vtanh.f32 %v928_v35  ;;  %v2796_v7 = vpop.eup %2795  ;;  %v1208_v35 = vadd.f32 %v3366_v59, %v2511_v40  ;;  %v944_v60 = vadd.f32 %v3366_v59, %v943_v38 }
 0x195   :  { %v2448_v3 = vpop.f32.mrf.mxu0  ;;  %2807 = vtanh.f32 %v1187_v50  ;;  %v2798_v17 = vpop.eup %2797  ;;  %v1420_v34 = vmul.f32 %v3392_v24, %v2796_v7  ;;  %v1830_v36 = vsel %vm1493_vm1, %v1477_v16, 0.0 }
 0x196   :  { %1630 = vadd.xlane.f32.xlu1 %v1629_v52  ;;  %v1839_v52 = vsel %vm1493_vm1, %v1480_v26, 0.0  ;;  %v955_v4 = vadd.f32 %v3366_v59, %v2448_v3  ;;  %2809 = vtanh.f32 %v1184_v54  ;;  %v1833_v26 = vsel %vm1493_vm1, %v1478_v6, 0.0  ;;  %v2800_v19 = vpop.eup %2799  ;;  %v1202_v54 = vpop.f32.mrf.mxu1 }
 0x197   :  { %1627 = vadd.xlane.f32.xlu0 %v1626_v56  ;;  %v3505_v61 = vpop.xlane.xlu1 %1540  ;;  %v1413_v56 = vmul.f32 %v3392_v24, %v2790_v37  ;;  %v1419_v37 = vmul.f32 %v3392_v24, %v2798_v17  ;;  %v2802_v50 = vpop.eup %2801 }
 0x198   :  { %v3507_v62 = vpop.xlane.xlu0 %1537  ;;  %2811 = vtanh.f32 %v955_v4  ;;  %v2515_v7 = vpop.f32.mrf.mxu1 }
 0x199   :  { %2813 = vtanh.f32 %v952_v47  ;;  %v1656_v4 = vsel %vm1493_vm1, %v1419_v37, 0.0 }
 0x19a   :  { %1822 = vadd.xlane.f32.xlu1 %v1821_v5  ;;  %v1641_v5 = vsel %vm1493_vm1, %v1414_v33, 0.0 }
 0x19b   :  { %1819 = vadd.xlane.f32.xlu0 %v1818_v11  ;;  %v3515_v18 = vpop.xlane.xlu1 %1732  ;;  %v1638_v11 = vsel %vm1493_vm1, %v1413_v56, 0.0  ;;  %v1484_v56 = vmul.f32 %v3392_v24, %v2800_v19 }
 0x19c   :  { %3833 = vst [vmem:[#allocation2_spill] sm:$0xff] %v3515_v18  ;;  %v3517_v20 = vpop.xlane.xlu0 %1729 }
 0x19d   :  { %3834 = vst [vmem:[#allocation3_spill] sm:$0xff] %v3517_v20  ;;  %v1851_v16 = vsel %vm1493_vm1, %v1484_v56, 0.0 }
 0x19e   :  { %1648 = vadd.xlane.f32.xlu1 %v1647_v23  ;;  %v1211_v23 = vadd.f32 %v3366_v59, %v2512_v22  ;;  %v2804_v40 = vpop.eup %2803  ;;  %v1200_v22 = vadd.f32 %v3366_v59, %v1199_v2 }
 0x19f   :  { %1645 = vadd.xlane.f32.xlu0 %v1644_v32  ;;  %v3525_v42 = vpop.xlane.xlu1 %1534  ;;  %v946_v32 = vpop.f32.mrf.mxu0  ;;  %v1418_v17 = vmul.f32 %v3392_v24, %v2804_v40 }
 0x1a0   :  { %v3527_v49 = vpop.xlane.xlu0 %1531  ;;  %v947_v44 = vadd.f32 %v3366_v59, %v946_v32  ;;  %2815 = vtanh.f32 %v1211_v23 }
 0x1a1   :  { %v2451_v33 = vpop.f32.mrf.mxu0  ;;  %2817 = vtanh.f32 %v1208_v35  ;;  %v2806_v6 = vpop.eup %2805 }
 0x1a2   :  { %1840 = vadd.xlane.f32.xlu1 %v1839_v52  ;;  %2819 = vtanh.f32 %v947_v44  ;;  %v2808_v38 = vpop.eup %2807  ;;  %v1215_v35 = vpop.f32.mrf.mxu1 }
 0x1a3   :  { %1837 = vadd.xlane.f32.xlu0 %v1836_v55  ;;  %v3541_v10 = vpop.xlane.xlu1 %1726  ;;  %v1659_v55 = vsel %vm1493_vm1, %v1420_v34, 0.0  ;;  %v959_v47 = vpop.f32.mrf.mxu0  ;;  %2821 = vtanh.f32 %v944_v60  ;;  %v1417_v34 = vmul.f32 %v3392_v24, %v2806_v6  ;;  %v1482_v2 = vmul.f32 %v3392_v24, %v2808_v38 }
 0x1a4   :  { %v3535_v1 = vpop.xlane.xlu0 %1723  ;;  %3835 = vst [vmem:[#allocation4_spill] sm:$0xff] %v3541_v10  ;;  %v2810_v19 = vpop.eup %2809 }
 0x1a5   :  { %v2812_v44 = vpop.eup %2811  ;;  %v1481_v56 = vmul.f32 %v3392_v24, %v2810_v19  ;;  %v1845_v6 = vsel %vm1493_vm1, %v1482_v2, 0.0  ;;  %v960_v2 = vadd.f32 %v3366_v59, %v959_v47 }
 0x1a6   :  { %1642 = vadd.xlane.f32.xlu1 %v1641_v5  ;;  %v1483_v5 = vmul.f32 %v3392_v24, %v2802_v50  ;;  %v1653_v50 = vsel %vm1493_vm1, %v1418_v17, 0.0  ;;  %v2814_v40 = vpop.eup %2813  ;;  %v1224_v17 = vadd.f32 %v3366_v59, %v2515_v7 }
 0x1a7   :  { %1639 = vadd.xlane.f32.xlu0 %v1638_v11  ;;  %v3553_v52 = vpop.xlane.xlu1 %1552  ;;  %v1203_v11 = vadd.f32 %v3366_v59, %v1202_v54  ;;  %v968_v54 = vadd.f32 %v3366_v59, %v2451_v33 }
 0x1a8   :  { %v3545_v21 = vpop.xlane.xlu0 %1549 }
 0x1a9   :  { %2823 = vtanh.f32 %v1203_v11  ;;  %v1424_v11 = vmul.f32 %v3392_v24, %v2812_v44 }
 0x1aa   :  { %1834 = vadd.xlane.f32.xlu1 %v1833_v26  ;;  %v1848_v26 = vsel %vm1493_vm1, %v1483_v5, 0.0  ;;  %2825 = vtanh.f32 %v1200_v22  ;;  %v1842_v22 = vsel %vm1493_vm1, %v1481_v56, 0.0 }
 0x1ab   :  { %1831 = vadd.xlane.f32.xlu0 %v1830_v36  ;;  %v3567_v23 = vpop.xlane.xlu1 %1744  ;;  %v2452_v36 = vpop.f32.mrf.mxu0 }
 0x1ac   :  { %v3559_v3 = vpop.xlane.xlu0 %1741  ;;  %v971_v37 = vadd.f32 %v3366_v59, %v2452_v36  ;;  %v1671_v36 = vsel %vm1493_vm1, %v1424_v11, 0.0  ;;  %v1216_v11 = vadd.f32 %v3366_v59, %v1215_v35 }
 0x1ad   :  { %v962_v38 = vpop.f32.mrf.mxu0 }
 0x1ae   :  { %1660 = vadd.xlane.f32.xlu1 %v1659_v55  ;;  %v1650_v55 = vsel %vm1493_vm1, %v1417_v34, 0.0  ;;  %2827 = vtanh.f32 %v971_v37  ;;  %v963_v19 = vadd.f32 %v3366_v59, %v962_v38 }
 0x1af   :  { %1657 = vadd.xlane.f32.xlu0 %v1656_v4  ;;  %v3579_v60 = vpop.xlane.xlu1 %1546  ;;  %v2516_v4 = vpop.f32.mrf.mxu1  ;;  %2829 = vtanh.f32 %v968_v54 }
 0x1b0   :  { %v3571_v32 = vpop.xlane.xlu0 %1543  ;;  %v1227_v5 = vadd.f32 %v3366_v59, %v2516_v4 }
 0x1b1   :  { %v1218_v7 = vpop.f32.mrf.mxu1 }
 0x1b2   :  { %1852 = vadd.xlane.f32.xlu1 %v1851_v16  ;;  %v2816_v16 = vpop.eup %2815  ;;  %2831 = vtanh.f32 %v1227_v5  ;;  %v1219_v4 = vadd.f32 %v3366_v59, %v1218_v7 }
 0x1b3   :  { %1849 = vadd.xlane.f32.xlu0 %v1848_v26  ;;  %v1423_v26 = vmul.f32 %v3392_v24, %v2814_v40  ;;  %v2818_v34 = vpop.eup %2817  ;;  %v1488_v37 = vmul.f32 %v3392_v24, %v2816_v16  ;;  %v3593_v44 = vpop.xlane.xlu1 %1738  ;;  %2833 = vtanh.f32 %v1224_v17 }
 0x1b4   :  { %v3584_v33 = vpop.xlane.xlu0 %1735  ;;  %2835 = vtanh.f32 %v963_v19 }
 0x1b5   :  { %v1668_v54 = vsel %vm1493_vm1, %v1423_v26, 0.0  ;;  %v1863_v5 = vsel %vm1493_vm1, %v1488_v37, 0.0  ;;  %2837 = vtanh.f32 %v960_v2 }
 0x1b6   :  { %1654 = vadd.xlane.f32.xlu1 %v1653_v50  ;;  %v2820_v50 = vpop.eup %2819  ;;  %2839 = vtanh.f32 %v1219_v4 }
 0x1b7   :  { %1651 = vadd.xlane.f32.xlu0 %v1650_v55  ;;  %v1487_v55 = vmul.f32 %v3392_v24, %v2818_v34  ;;  %v2822_v56 = vpop.eup %2821  ;;  %v1422_v47 = vmul.f32 %v3392_v24, %v2820_v50  ;;  %2841 = vtanh.f32 %v1216_v11 }
 0x1b8   :  { %v3597_v40 = vpop.xlane.xlu0 %1561  ;;  %v1421_v17 = vmul.f32 %v3392_v24, %v2822_v56 }
 0x1b9   :  { %v1860_v16 = vsel %vm1493_vm1, %v1487_v55, 0.0  ;;  %v1665_v26 = vsel %vm1493_vm1, %v1422_v47, 0.0 }
 0x1ba   :  { %1846 = vadd.xlane.f32.xlu1 %v1845_v6  ;;  %v2824_v6 = vpop.eup %2823  ;;  %v1662_v59 = vsel %vm1493_vm1, %v1421_v17, 0.0 }
 0x1bb   :  { %1843 = vadd.xlane.f32.xlu0 %v1842_v22  ;;  %v2826_v38 = vpop.eup %2825  ;;  %v3605_v22 = vpop.xlane.xlu1 %1564  ;;  %v1486_v34 = vmul.f32 %v3392_v24, %v2824_v6 }
 0x1bc   :  { %v2828_v19 = vpop.eup %2827  ;;  %v1485_v35 = vmul.f32 %v3392_v24, %v2826_v38 }
 0x1bd   :  { %v2830_v37 = vpop.eup %2829  ;;  %v1857_v50 = vsel %vm1493_vm1, %v1486_v34, 0.0  ;;  %v1428_v2 = vmul.f32 %v3392_v24, %v2828_v19 }
 0x1be   :  { %1672 = vadd.xlane.f32.xlu1 %v1671_v36  ;;  %v3609_v36 = vpop.xlane.xlu0 %1753  ;;  %v1854_v55 = vsel %vm1493_vm1, %v1485_v35, 0.0  ;;  %v1427_v56 = vmul.f32 %v3392_v24, %v2830_v37 }
 0x1bf   :  { %1669 = vadd.xlane.f32.xlu0 %v1668_v54  ;;  %v2832_v7 = vpop.eup %2831  ;;  %v3615_v54 = vpop.xlane.xlu1 %1756  ;;  %v1683_v47 = vsel %vm1493_vm1, %v1428_v2, 0.0 }
 0x1c0   :  { %v2834_v4 = vpop.eup %2833  ;;  %v1492_v6 = vmul.f32 %v3392_v24, %v2832_v7 }
 0x1c1   :  { %v2836_v11 = vpop.eup %2835  ;;  %v1491_v17 = vmul.f32 %v3392_v24, %v2834_v4 }
 0x1c2   :  { %1864 = vadd.xlane.f32.xlu1 %v1863_v5  ;;  %v1556_v5 = vpop.xlane.xlu0 %1555  ;;  %v2838_v38 = vpop.eup %2837  ;;  %v1875_v34 = vsel %vm1493_vm1, %v1492_v6, 0.0  ;;  %v1426_v19 = vmul.f32 %v3392_v24, %v2836_v11 }
 0x1c3   :  { %1861 = vadd.xlane.f32.xlu0 %v1860_v16  ;;  %v1680_v16 = vsel %vm1493_vm1, %v1427_v56, 0.0  ;;  %v1872_v37 = vsel %vm1493_vm1, %v1491_v17, 0.0 }
 0x1c4   :  { %v1677_v7 = vsel %vm1493_vm1, %v1426_v19, 0.0 }
 0x1c6   :  { %1666 = vadd.xlane.f32.xlu1 %v1665_v26  ;;  %v1559_v26 = vpop.xlane.xlu1 %1558  ;;  %v3625_v35 = vpop.xlane.xlu0 %1747 }
 0x1c7   :  { %1663 = vadd.xlane.f32.xlu0 %v1662_v59  ;;  %v2840_v59 = vpop.eup %2839 }
 0x1c8   :  { %v2842_v2 = vpop.eup %2841 }
 0x1ca   :  { %1858 = vadd.xlane.f32.xlu1 %v1857_v50  ;;  %v1425_v50 = vmul.f32 %v3392_v24, %v2838_v38  ;;  %v3631_v56 = vpop.xlane.xlu1 %1750  ;;  %v1574_v6 = vpop.xlane.xlu0 %1573 }
 0x1cb   :  { %1855 = vadd.xlane.f32.xlu0 %v1854_v55  ;;  %v1490_v55 = vmul.f32 %v3392_v24, %v2840_v59 }
 0x1cc   :  { %v1674_v4 = vsel %vm1493_vm1, %v1425_v50, 0.0 }
 0x1cd   :  { %v1869_v11 = vsel %vm1493_vm1, %v1490_v55, 0.0 }
 0x1ce   :  { %1684 = vadd.xlane.f32.xlu1 %v1683_v47  ;;  %v1489_v47 = vmul.f32 %v3392_v24, %v2842_v2  ;;  %v1577_v17 = vpop.xlane.xlu1 %1576  ;;  %v3637_v38 = vpop.xlane.xlu0 %1765 }
 0x1cf   :  { %1681 = vadd.xlane.f32.xlu0 %v1680_v16 }
 0x1d0   :  { %v1866_v16 = vsel %vm1493_vm1, %v1489_v47, 0.0 }
 0x1d2   :  { %1876 = vadd.xlane.f32.xlu1 %v1875_v34  ;;  %v3639_v34 = vpop.xlane.xlu1 %1768  ;;  %v1568_v19 = vpop.xlane.xlu0 %1567 }
 0x1d3   :  { %1873 = vadd.xlane.f32.xlu0 %v1872_v37 }
 0x1d6   :  { %1678 = vadd.xlane.f32.xlu1 %v1677_v7  ;;  %v1571_v59 = vpop.xlane.xlu1 %1570  ;;  %v3641_v37 = vpop.xlane.xlu0 %1759 }
 0x1d7   :  { %1675 = vadd.xlane.f32.xlu0 %v1674_v4 }
 0x1da   :  { %1870 = vadd.xlane.f32.xlu1 %v1869_v11  ;;  %v3643_v50 = vpop.xlane.xlu1 %1762  ;;  %v1586_v24 = vpop.xlane.xlu0 %1585 }
 0x1db   :  { %1867 = vadd.xlane.f32.xlu0 %v1866_v16 }
 0x1de   :  { %v1589_v2 = vpop.xlane.xlu1 %1588  ;;  %v3645_v7 = vpop.xlane.xlu0 %1777 }
 0x1df   :  { %3836 = vst [vmem:[#allocation5_spill] sm:$0xff] %v3645_v7 }
 0x1e2   :  { %v3647_v55 = vpop.xlane.xlu1 %1780  ;;  %v1580_v4 = vpop.xlane.xlu0 %1579 }
 0x1e3   :  { %3837 = vst [vmem:[#allocation6_spill] sm:$0xff] %v3647_v55 }
 0x1e6   :  { %v1583_v47 = vpop.xlane.xlu1 %1582  ;;  %v3649_v11 = vpop.xlane.xlu0 %1771 }
 0x1ea   :  { %v3651_v16 = vpop.xlane.xlu1 %1774  ;;  %v3653_v18 = vpop.xlane.xlu0 %1597 }
 0x1ee   :  { %v3656_v20 = vpop.xlane.xlu1 %1600  ;;  %v3660_v10 = vpop.xlane.xlu0 %1789 }
 0x1f2   :  { %v3664_v55 = vpop.xlane.xlu1 %1792  ;;  %v3666_v7 = vpop.xlane.xlu0 %1591 }
 0x208   :  { %1878 = vxpose.xlu0.b32.start [1/16] (narrow) %v3397_v27, 8  ;;  %v3670_v27 = vpop.xlane.xlu1 %1594 }
 0x20c   :  { %1879 = vxpose.xlu0.b32.cont [2/16] (narrow) %v3417_v53, 8  ;;  %v3674_v53 = vpop.xlane.xlu0 %1783 }
 0x20d   :  { %1910 = vxpose.xlu1.b32.start [1/16] (narrow) %v3571_v32, 8 }
 0x210   :  { %1880 = vxpose.xlu0.b32.cont [3/16] (narrow) %v3380_v14, 8  ;;  %v3677_v14 = vpop.xlane.xlu1 %1786  ;;  %v3679_v32 = vpop.xlane.xlu0 %1609 }
 0x211   :  { %1911 = vxpose.xlu1.b32.cont [2/16] (narrow) %v3579_v60, 8 }
 0x214   :  { %1881 = vxpose.xlu0.b32.cont [4/16] (narrow) %v3395_v28, 8  ;;  %v3682_v28 = vpop.xlane.xlu1 %1612 }
 0x215   :  { %1912 = vxpose.xlu1.b32.cont [3/16] (narrow) %v3545_v21, 8 }
 0x218   :  { %1882 = vxpose.xlu0.b32.cont [5/16] (narrow) %v3447_v31, 8  ;;  %v3686_v31 = vpop.xlane.xlu0 %1801 }
 0x219   :  { %1913 = vxpose.xlu1.b32.cont [4/16] (narrow) %v3553_v52, 8 }
 0x21c   :  { %1883 = vxpose.xlu0.b32.cont [6/16] (narrow) %v3445_v29, 8  ;;  %v3690_v29 = vpop.xlane.xlu1 %1804  ;;  %v3692_v21 = vpop.xlane.xlu0 %1603 }
 0x21d   :  { %1914 = vxpose.xlu1.b32.cont [5/16] (narrow) %v1556_v5, 8  ;;  %v3841_v5 = vld [vmem:[#allocation5_spill] sm:$0xff] }
 0x220   :  { %1884 = vxpose.xlu0.b32.cont [7/16] (narrow) %v3427_v0, 8  ;;  %v3695_v0 = vpop.xlane.xlu1 %1606 }
 0x221   :  { %1915 = vxpose.xlu1.b32.cont [6/16] (narrow) %v1559_v26, 8  ;;  %v3842_v26 = vld [vmem:[#allocation6_spill] sm:$0xff] }
 0x224   :  { %1885 = vxpose.xlu0.b32.cont [8/16] (narrow) %v3425_v63, 8  ;;  %v3698_v63 = vpop.xlane.xlu0 %1795 }
 0x225   :  { %1916 = vxpose.xlu1.b32.cont [7/16] (narrow) %v3597_v40, 8 }
 0x228   :  { %1886 = vxpose.xlu0.b32.cont [9/16] (narrow) %v3487_v30, 8  ;;  %v3701_v30 = vpop.xlane.xlu1 %1798  ;;  %v3703_v52 = vpop.xlane.xlu0 %1621 }
 0x229   :  { %1917 = vxpose.xlu1.b32.cont [8/16] (narrow) %v3605_v22, 8 }
 0x22c   :  { %1887 = vxpose.xlu0.b32.cont [10/16] (narrow) %v3485_v25, 8  ;;  %v3706_v60 = vpop.xlane.xlu1 %1624  ;;  %v3709_v25 = vpop.xlane.xlu0 %1813 }
 0x22d   :  { %1918 = vxpose.xlu1.b32.cont [9/16] (narrow) %v1568_v19, 8 }
 0x230   :  { %1888 = vxpose.xlu0.b32.cont [11/16] (narrow) %v3467_v58, 8  ;;  %v3712_v58 = vpop.xlane.xlu1 %1816 }
 0x231   :  { %1919 = vxpose.xlu1.b32.cont [10/16] (narrow) %v1571_v59, 8 }
 0x234   :  { %1889 = vxpose.xlu0.b32.cont [12/16] (narrow) %v3465_v57, 8  ;;  %v3714_v57 = vpop.xlane.xlu0 %1615  ;;  %v3717_v40 = vpop.xlane.xlu1 %1618 }
 0x235   :  { %1920 = vxpose.xlu1.b32.cont [11/16] (narrow) %v1574_v6, 8 }
 0x238   :  { %1890 = vxpose.xlu0.b32.cont [13/16] (narrow) %v3527_v49, 8  ;;  %v3720_v49 = vpop.xlane.xlu0 %1807 }
 0x239   :  { %1921 = vxpose.xlu1.b32.cont [12/16] (narrow) %v1577_v17, 8 }
 0x23c   :  { %1891 = vxpose.xlu0.b32.cont [14/16] (narrow) %v3525_v42, 8  ;;  %v3726_v42 = vpop.xlane.xlu0 %1633 }
 0x23d   :  { %1922 = vxpose.xlu1.b32.cont [13/16] (narrow) %v1580_v4, 8 }
 0x240   :  { %1892 = vxpose.xlu0.b32.cont [15/16] (narrow) %v3507_v62, 8  ;;  %v3724_v62 = vpop.xlane.xlu1 %1810 }
 0x241   :  { %1923 = vxpose.xlu1.b32.cont [14/16] (narrow) %v1583_v47, 8 }
 0x244   :  { %1893 = vxpose.xlu0.b32.end [16/16] (narrow) %v3505_v61, 8  ;;  %v3730_v61 = vpop.xlane.xlu1 %1636 }
 0x245   :  { %1924 = vxpose.xlu1.b32.cont [15/16] (narrow) %v1586_v24, 8 }
 0x248   :  { %2006 = vxpose.xlu0.b32.start [1/16] (narrow) %v3407_v41, 8  ;;  %v3734_v41 = vpop.xlane.xlu0 %1825 }
 0x249   :  { %1925 = vxpose.xlu1.b32.end [16/16] (narrow) %v1589_v2, 8 }
 0x24c   :  { %2007 = vxpose.xlu0.b32.cont [2/16] (narrow) %v3415_v51, 8  ;;  %v3738_v51 = vpop.xlane.xlu1 %1828 }
 0x24d   :  { %2038 = vxpose.xlu1.b32.start [1/16] (narrow) %v3584_v33, 8  ;;  %v3740_v33 = vpop.xlane.xlu0 %1627 }
 0x250   :  { %2008 = vxpose.xlu0.b32.cont [3/16] (narrow) %v3382_v15, 8  ;;  %v3744_v15 = vpop.xlane.xlu1 %1630 }
 0x251   :  { %2039 = vxpose.xlu1.b32.cont [2/16] (narrow) %v3593_v44, 8  ;;  %v3838_v44 = vld [vmem:[#allocation4_spill] sm:$0xff] }
 0x254   :  { %2009 = vxpose.xlu0.b32.cont [4/16] (narrow) %v3405_v39, 8  ;;  %v3748_v39 = vpop.xlane.xlu0 %1819 }
 0x255   :  { %2040 = vxpose.xlu1.b32.cont [3/16] (narrow) %v3559_v3, 8 }
 0x258   :  { %2010 = vxpose.xlu0.b32.cont [5/16] (narrow) %v3457_v45, 8  ;;  %v3752_v45 = vpop.xlane.xlu1 %1822  ;;  %v1646_v3 = vpop.xlane.xlu0 %1645 }
 0x259   :  { %2041 = vxpose.xlu1.b32.cont [4/16] (narrow) %v3567_v23, 8 }
 0x25c   :  { %2011 = vxpose.xlu0.b32.cont [6/16] (narrow) %v3455_v43, 8  ;;  %v1649_v43 = vpop.xlane.xlu1 %1648 }
 0x25d   :  { %2042 = vxpose.xlu1.b32.cont [5/16] (narrow) %v3625_v35, 8 }
 0x260   :  { %2012 = vxpose.xlu0.b32.cont [7/16] (narrow) %v3437_v13, 8  ;;  %v3758_v13 = vpop.xlane.xlu0 %1837 }
 0x261   :  { %2043 = vxpose.xlu1.b32.cont [6/16] (narrow) %v3631_v56, 8 }
 0x264   :  { %2013 = vxpose.xlu0.b32.cont [8/16] (narrow) %v3435_v12, 8  ;;  %v3762_v12 = vpop.xlane.xlu1 %1840  ;;  %v1640_v23 = vpop.xlane.xlu0 %1639 }
 0x265   :  { %2044 = vxpose.xlu1.b32.cont [7/16] (narrow) %v3609_v36, 8  ;;  %v3839_v36 = vld [vmem:[#allocation3_spill] sm:$0xff] }
 0x268   :  { %2014 = vxpose.xlu0.b32.cont [9/16] (narrow) %v3497_v48, 8  ;;  %v1643_v48 = vpop.xlane.xlu1 %1642 }
 0x269   :  { %2045 = vxpose.xlu1.b32.cont [8/16] (narrow) %v3615_v54, 8  ;;  %v3840_v54 = vld [vmem:[#allocation2_spill] sm:$0xff] }
 0x26c   :  { %2015 = vxpose.xlu0.b32.cont [10/16] (narrow) %v3495_v46, 8  ;;  %v3768_v46 = vpop.xlane.xlu0 %1831 }
 0x26d   :  { %2046 = vxpose.xlu1.b32.cont [9/16] (narrow) %v3641_v37, 8 }
 0x270   :  { %2016 = vxpose.xlu0.b32.cont [11/16] (narrow) %v3477_v9, 8  ;;  %v3772_v9 = vpop.xlane.xlu1 %1834  ;;  %v1658_v22 = vpop.xlane.xlu0 %1657 }
 0x271   :  { %2047 = vxpose.xlu1.b32.cont [10/16] (narrow) %v3643_v50, 8 }
 0x274   :  { %2017 = vxpose.xlu0.b32.cont [12/16] (narrow) %v3475_v8, 8  ;;  %v1661_v8 = vpop.xlane.xlu1 %1660 }
 0x275   :  { %2048 = vxpose.xlu1.b32.cont [11/16] (narrow) %v3637_v38, 8 }
 0x278   :  { %2018 = vxpose.xlu0.b32.cont [13/16] (narrow) %v3535_v1, 8  ;;  %v3778_v1 = vpop.xlane.xlu0 %1849  ;;  %v3782_v35 = vpop.xlane.xlu1 %1852 }
 0x279   :  { %2049 = vxpose.xlu1.b32.cont [12/16] (narrow) %v3639_v34, 8 }
 0x27c   :  { %2019 = vxpose.xlu0.b32.cont [14/16] (narrow) %v3838_v44, 8  ;;  %v1652_v56 = vpop.xlane.xlu0 %1651  ;;  %v1655_v6 = vpop.xlane.xlu1 %1654 }
 0x27d   :  { %2050 = vxpose.xlu1.b32.cont [13/16] (narrow) %v3649_v11, 8 }
 0x280   :  { %2020 = vxpose.xlu0.b32.cont [15/16] (narrow) %v3839_v36, 8  ;;  %v1844_v17 = vpop.xlane.xlu0 %1843  ;;  %v1847_v38 = vpop.xlane.xlu1 %1846 }
 0x281   :  { %2051 = vxpose.xlu1.b32.cont [14/16] (narrow) %v3651_v16, 8 }
 0x284   :  { %2021 = vxpose.xlu0.b32.end [16/16] (narrow) %v3840_v54, 8  ;;  %v1670_v34 = vpop.xlane.xlu0 %1669  ;;  %v1673_v19 = vpop.xlane.xlu1 %1672 }
 0x285   :  { %2052 = vxpose.xlu1.b32.cont [15/16] (narrow) %v3841_v5, 8 }
 0x288   :  { %1942 = vxpose.xlu0.b32.start [1/16] (narrow) %v3666_v7, 8  ;;  %v1862_v59 = vpop.xlane.xlu0 %1861  ;;  %v1865_v37 = vpop.xlane.xlu1 %1864 }
 0x289   :  { %2053 = vxpose.xlu1.b32.end [16/16] (narrow) %v3842_v26, 8 }
 0x28c   :  { %1943 = vxpose.xlu0.b32.cont [2/16] (narrow) %v3670_v27, 8 }
 0x28d   :  { %1974 = vxpose.xlu1.b32.start [1/16] (narrow) %v1640_v23, 8 }
 0x290   :  { %1944 = vxpose.xlu0.b32.cont [3/16] (narrow) %v3653_v18, 8  ;;  %v1664_v18 = vpop.xlane.xlu0 %1663 }
 0x291   :  { %1975 = vxpose.xlu1.b32.cont [2/16] (narrow) %v1643_v48, 8 }
 0x294   :  { %1945 = vxpose.xlu0.b32.cont [4/16] (narrow) %v3656_v20, 8  ;;  %v1667_v20 = vpop.xlane.xlu1 %1666  ;;  %v1856_v50 = vpop.xlane.xlu0 %1855 }
 0x295   :  { %1976 = vxpose.xlu1.b32.cont [3/16] (narrow) %v1646_v3, 8 }
 0x298   :  { %1946 = vxpose.xlu0.b32.cont [5/16] (narrow) %v3692_v21, 8  ;;  %v1859_v24 = vpop.xlane.xlu1 %1858  ;;  %v1682_v2 = vpop.xlane.xlu0 %1681 }
 0x299   :  { %1977 = vxpose.xlu1.b32.cont [4/16] (narrow) %v1649_v43, 8 }
 0x29c   :  { %1947 = vxpose.xlu0.b32.cont [6/16] (narrow) %v3695_v0, 8  ;;  %v1685_v7 = vpop.xlane.xlu1 %1684  ;;  %v1874_v4 = vpop.xlane.xlu0 %1873 }
 0x29d   :  { %1978 = vxpose.xlu1.b32.cont [5/16] (narrow) %v1652_v56, 8 }
 0x2a0   :  { %1948 = vxpose.xlu0.b32.cont [7/16] (narrow) %v3679_v32, 8  ;;  %v1877_v47 = vpop.xlane.xlu1 %1876  ;;  %v1676_v11 = vpop.xlane.xlu0 %1675 }
 0x2a1   :  { %1979 = vxpose.xlu1.b32.cont [6/16] (narrow) %v1655_v6, 8 }
 0x2a4   :  { %1949 = vxpose.xlu0.b32.cont [8/16] (narrow) %v3682_v28, 8  ;;  %v1679_v16 = vpop.xlane.xlu1 %1678 }
 0x2a5   :  { %1980 = vxpose.xlu1.b32.cont [7/16] (narrow) %v1658_v22, 8 }
 0x2a8   :  { %1950 = vxpose.xlu0.b32.cont [9/16] (narrow) %v3714_v57, 8 }
 0x2a9   :  { %1981 = vxpose.xlu1.b32.cont [8/16] (narrow) %v1661_v8, 8 }
 0x2ac   :  { %1951 = vxpose.xlu0.b32.cont [10/16] (narrow) %v3717_v40, 8 }
 0x2ad   :  { %1982 = vxpose.xlu1.b32.cont [9/16] (narrow) %v1664_v18, 8 }
 0x2b0   :  { %1952 = vxpose.xlu0.b32.cont [11/16] (narrow) %v3703_v52, 8 }
 0x2b1   :  { %1983 = vxpose.xlu1.b32.cont [10/16] (narrow) %v1667_v20, 8 }
 0x2b4   :  { %1953 = vxpose.xlu0.b32.cont [12/16] (narrow) %v3706_v60, 8 }
 0x2b5   :  { %1984 = vxpose.xlu1.b32.cont [11/16] (narrow) %v1670_v34, 8 }
 0x2b8   :  { %1954 = vxpose.xlu0.b32.cont [13/16] (narrow) %v3740_v33, 8 }
 0x2b9   :  { %1985 = vxpose.xlu1.b32.cont [12/16] (narrow) %v1673_v19, 8 }
 0x2bc   :  { %1955 = vxpose.xlu0.b32.cont [14/16] (narrow) %v3744_v15, 8 }
 0x2bd   :  { %1986 = vxpose.xlu1.b32.cont [13/16] (narrow) %v1676_v11, 8 }
 0x2c0   :  { %1956 = vxpose.xlu0.b32.cont [15/16] (narrow) %v3726_v42, 8 }
 0x2c1   :  { %1987 = vxpose.xlu1.b32.cont [14/16] (narrow) %v1679_v16, 8 }
 0x2c4   :  { %1957 = vxpose.xlu0.b32.end [16/16] (narrow) %v3730_v61, 8 }
 0x2c5   :  { %1988 = vxpose.xlu1.b32.cont [15/16] (narrow) %v1682_v2, 8 }
 0x2c8   :  { %2070 = vxpose.xlu0.b32.start [1/16] (narrow) %v3674_v53, 8 }
 0x2c9   :  { %1989 = vxpose.xlu1.b32.end [16/16] (narrow) %v1685_v7, 8 }
 0x2cc   :  { %2071 = vxpose.xlu0.b32.cont [2/16] (narrow) %v3677_v14, 8 }
 0x2cd   :  { %2102 = vxpose.xlu1.b32.start [1/16] (narrow) %v3768_v46, 8 }
 0x2d0   :  { %2072 = vxpose.xlu0.b32.cont [3/16] (narrow) %v3660_v10, 8  ;;  %v1868_v10 = vpop.xlane.xlu0 %1867 }
 0x2d1   :  { %2103 = vxpose.xlu1.b32.cont [2/16] (narrow) %v3772_v9, 8 }
 0x2d4   :  { %2073 = vxpose.xlu0.b32.cont [4/16] (narrow) %v3664_v55, 8  ;;  %v1871_v55 = vpop.xlane.xlu1 %1870  ;;  %v1894_v27 = vpop.trf.xlu0 }
 0x2d5   :  { %2104 = vxpose.xlu1.b32.cont [3/16] (narrow) %v3758_v13, 8 }
 0x2d8   :  { %2074 = vxpose.xlu0.b32.cont [5/16] (narrow) %v3698_v63, 8  ;;  %v1926_v53 = vpop.trf.xlu1  ;;  %v2022_v14 = vpop.trf.xlu0 }
 0x2d9   :  { %2105 = vxpose.xlu1.b32.cont [4/16] (narrow) %v3762_v12, 8  ;;  %v2135_v28 = vrot.slane %v1926_v53, 7  ;;  %v2144_v52 = vrot.slane %v2022_v14, 4 }
 0x2db   :  { %v2156_v0 = vsel %vm2155_vm2, %v1894_v27, %v2135_v28 }
 0x2dc   :  { %2075 = vxpose.xlu0.b32.cont [6/16] (narrow) %v3701_v30, 8  ;;  %v2054_v32 = vpop.trf.xlu1 }
 0x2dd   :  { %2106 = vxpose.xlu1.b32.cont [5/16] (narrow) %v1844_v17, 8 }
 0x2e0   :  { %2076 = vxpose.xlu0.b32.cont [7/16] (narrow) %v3686_v31, 8 }
 0x2e1   :  { %2107 = vxpose.xlu1.b32.cont [6/16] (narrow) %v1847_v38, 8 }
 0x2e4   :  { %2077 = vxpose.xlu0.b32.cont [8/16] (narrow) %v3690_v29, 8 }
 0x2e5   :  { %2108 = vxpose.xlu1.b32.cont [7/16] (narrow) %v3778_v1, 8 }
 0x2e8   :  { %2078 = vxpose.xlu0.b32.cont [9/16] (narrow) %v3720_v49, 8  ;;  %v2169_v49 = vld [vmem:[%s3831_s4] sm:$0xff] }
 0x2e9   :  { %2109 = vxpose.xlu1.b32.cont [8/16] (narrow) %v3782_v35, 8  ;;  %vm2170_vm9 = vcmp.ne.s32.totalorder %v2169_v49, 0 }
 0x2ec   :  { %2079 = vxpose.xlu0.b32.cont [10/16] (narrow) %v3724_v62, 8 }
 0x2ed   :  { %2110 = vxpose.xlu1.b32.cont [9/16] (narrow) %v1856_v50, 8 }
 0x2f0   :  { %2080 = vxpose.xlu0.b32.cont [11/16] (narrow) %v3709_v25, 8 }
 0x2f1   :  { %2111 = vxpose.xlu1.b32.cont [10/16] (narrow) %v1859_v24, 8 }
 0x2f4   :  { %2081 = vxpose.xlu0.b32.cont [12/16] (narrow) %v3712_v58, 8  ;;  %v2147_v58 = vrot.slane %v2054_v32, 3 }
 0x2f5   :  { %2112 = vxpose.xlu1.b32.cont [11/16] (narrow) %v1862_v59, 8 }
 0x2f8   :  { %2082 = vxpose.xlu0.b32.cont [13/16] (narrow) %v3748_v39, 8 }
 0x2f9   :  { %2113 = vxpose.xlu1.b32.cont [12/16] (narrow) %v1865_v37, 8 }
 0x2fc   :  { %2083 = vxpose.xlu0.b32.cont [14/16] (narrow) %v3752_v45, 8 }
 0x2fd   :  { %2114 = vxpose.xlu1.b32.cont [13/16] (narrow) %v1868_v10, 8 }
 0x300   :  { %2084 = vxpose.xlu0.b32.cont [15/16] (narrow) %v3734_v41, 8 }
 0x301   :  { %2115 = vxpose.xlu1.b32.cont [14/16] (narrow) %v1871_v55, 8 }
 0x304   :  { %2085 = vxpose.xlu0.b32.end [16/16] (narrow) %v3738_v51, 8  ;;  %v1958_v31 = vpop.trf.xlu0 }
 0x305   :  { %2116 = vxpose.xlu1.b32.cont [15/16] (narrow) %v1874_v4, 8  ;;  %v2138_v29 = vrot.slane %v1958_v31, 6 }
 0x307   :  { %v2158_v30 = vsel %vm2157_vm3, %v2156_v0, %v2138_v29 }
 0x309   :  { %2117 = vxpose.xlu1.b32.end [16/16] (narrow) %v1877_v47, 8  ;;  %v1990_v21 = vpop.trf.xlu1 }
 0x30a   :  { %v2141_v63 = vrot.slane %v1990_v21, 5 }
 0x30c   :  { %v2160_v60 = vsel %vm2159_vm4, %v2158_v30, %v2141_v63 }
 0x30d   :  { %v2162_v57 = vsel %vm2161_vm5, %v2160_v60, %v2144_v52 }
 0x30e   :  { %v2164_v61 = vsel %vm2163_vm6, %v2162_v57, %v2147_v58 }
 0x344   :  { %v2086_v25 = vpop.trf.xlu0 }
 0x345   :  { %v2150_v40 = vrot.slane %v2086_v25, 2 }
 0x347   :  { %v2166_v41 = vsel %vm2165_vm7, %v2164_v61, %v2150_v40 }
 0x349   :  { %v2118_v62 = vpop.trf.xlu1 }
 0x34a   :  { %v2153_v42 = vrot.slane %v2118_v62, 1 }
 0x34c   :  { %v2168_v51 = vsel %vm2167_vm8, %v2166_v41, %v2153_v42 }
 0x34d   :  { %v2171_v33 = vsel %vm2170_vm9, -1e+30, %v2168_v51 }
 0x34e   :  { %2172 = vmax.xlane.f32.xlu0 %v2171_v33 }
 0x3d7   :  { %v2173_v15 = vpop.xlane.xlu0 %2172 }
 0x3d8   :  { %v2174_v39 = vsub.f32 %v2171_v33, %v2173_v15 }
 0x3da   :  { %v2175_v45 = vmul.f32 1.442695, %v2174_v39 }
 0x3dc   :  { %2843 = vpow2.f32 %v2175_v45 }
 0x3e9   :  { %v2844_v3 = vpop.eup %2843 }
 0x3ea   :  { %2177 = vadd.xlane.f32.xlu1 %v2844_v3 }
 0x473   :  { %v2178_v43 = vpop.xlane.xlu1 %2177 }
 0x474   :  { %2845 = vrcp.f32 %v2178_v43 }
 0x481   :  { %v2846_v13 = vpop.eup %2845 }
 0x482   :  { %v2181_v12 = vmul.f32 %v2846_v13, %v2844_v3 }
 0x484   :  { %2182 = vst [vmem:[%s3832_s5] sm:$0xff] %v2181_v12 }

</bundles_post_ra>
